<compile_context>
chip_gen: v5e
topology: v5e:2x2
jax: 0.10.0
libtpu: 0.0.40
codegen_flags: <defaults>
</compile_context>

<pallas_src>
import functools

import jax
import jax.numpy as jnp
from jax import lax
from jax.experimental import pallas as pl
from jax.experimental.pallas import tpu as pltpu


def _mha_flash_kernel(xq_ref, xkv_ref, wq_ref, wk_ref, wv_ref, wp_ref, bp_ref,
                      o_ref, q_sc, m_sc, l_sc, acc_sc,
                      *, n_head, q_block, kv_block):
    # xq_ref : (1, q_block, C)   q-rows of x for this tile       (matmul dtype)
    # xkv_ref: (1, kv_block, C)  kv-rows of x for this tile      (matmul dtype)
    # w*_ref : (C, C)            packed projections, "x @ W"     (matmul dtype)
    # wp_ref : (C, C)            output projection               (matmul dtype)
    # bp_ref : (1, C)            output projection bias          (f32)
    # o_ref  : (1, q_block, C)   final output tile (lane-dense)
    # q_sc   : (q_block, C)      scaled, projected q (matmul dtype)
    # m_sc   : (q_block, n_head) running row max                 (f32)
    # l_sc   : (q_block, n_head) running softmax denom           (f32)
    # acc_sc : (q_block, C)      unnormalized per-head output    (f32)
    qi = pl.program_id(1)
    kvi = pl.program_id(2)
    n_kv = pl.num_programs(2)

    C = xq_ref.shape[-1]
    H = C // n_head
    mm = wq_ref.dtype                           # MXU operand dtype
    scale = jnp.float32(1.0 / (C ** 0.5))       # module scales by 1/sqrt(n_embd)

    q_first = qi * q_block                      # global row range of this q tile
    q_last = q_first + (q_block - 1)
    kv_first = kvi * kv_block                   # global col range of this kv tile
    kv_last = kv_first + (kv_block - 1)

    # ---- once per q tile (first kv step): project+scale q, reset state ----
    @pl.when(kvi == 0)
    def _init():
        q = jnp.dot(xq_ref[0], wq_ref[...], preferred_element_type=jnp.float32)
        q_sc[...] = (q * scale).astype(q_sc.dtype)     # fold 1/sqrt(C) into q
        m_sc[...] = jnp.full(m_sc.shape, -jnp.inf, m_sc.dtype)
        l_sc[...] = jnp.zeros(l_sc.shape, l_sc.dtype)
        acc_sc[...] = jnp.zeros(acc_sc.shape, acc_sc.dtype)

    # ---- process this kv block unless it lies entirely above the diagonal ----
    @pl.when(kv_first <= q_last)
    def _process():
        k = jnp.dot(xkv_ref[0], wk_ref[...],
                    preferred_element_type=jnp.float32).astype(mm)
        v = jnp.dot(xkv_ref[0], wv_ref[...],
                    preferred_element_type=jnp.float32).astype(mm)
        q = q_sc[...]

        def do_block(masked):
            if masked:   # only the diagonal-straddling block pays for the mask
                row = q_first + lax.broadcasted_iota(
                    jnp.int32, (q_block, kv_block), 0)
                col = kv_first + lax.broadcasted_iota(
                    jnp.int32, (q_block, kv_block), 1)
                allowed = col <= row
            for h in range(n_head):              # static trace-time loop
                sl = slice(h * H, (h + 1) * H)
                # scores: contract last dims (no transposed copy of k)
                s = lax.dot_general(q[:, sl], k[:, sl],
                                    (((1,), (1,)), ((), ())),
                                    preferred_element_type=jnp.float32)
                if masked:
                    s = jnp.where(allowed, s, jnp.float32(-1e30))
                # online softmax (all elementwise math in f32)
                m_prev = m_sc[:, h:h + 1]
                m_new = jnp.maximum(m_prev, jnp.max(s, axis=-1, keepdims=True))
                alpha = jnp.exp(m_prev - m_new)
                p = jnp.exp(s - m_new)
                l_sc[:, h:h + 1] = (alpha * l_sc[:, h:h + 1]
                                    + jnp.sum(p, axis=-1, keepdims=True))
                pv = jnp.dot(p.astype(mm), v[:, sl],
                             preferred_element_type=jnp.float32)
                acc_sc[:, sl] = alpha * acc_sc[:, sl] + pv
                m_sc[:, h:h + 1] = m_new

        @pl.when(kv_last <= q_first)      # fully below the diagonal: no mask
        def _():
            do_block(masked=False)

        @pl.when(kv_last > q_first)       # straddles the diagonal: apply mask
        def _():
            do_block(masked=True)

    # ---- last kv step: normalize, fused output projection, lane-dense write ----
    @pl.when(kvi == n_kv - 1)
    def _finalize():
        inv = pl.reciprocal(l_sc[...], approx=False)   # exact: free accuracy win
        for h in range(n_head):
            sl = slice(h * H, (h + 1) * H)
            acc_sc[:, sl] = acc_sc[:, sl] * inv[:, h:h + 1]
        y = jnp.dot(acc_sc[...].astype(mm), wp_ref[...],
                    preferred_element_type=jnp.float32)
        y = y + bp_ref[...]                            # (1,C) broadcasts
        o_ref[0] = y.astype(o_ref.dtype)


def multi_head_attention(x, wq, wk, wv, wp, bp, *,
                         q_block=None, kv_block=None, matmul_dtype=None):
    """
    x  : (B, T, C)
    wq, wk, wv : (n_head, C, H)   per-head weights, "x @ W" convention
    wp : (C, C)                   output projection, "x @ W" convention
    bp : (C,)
    matmul_dtype : dtype fed to the MXU (e.g. jnp.bfloat16); default x.dtype.
    returns (B, T, C) in x.dtype
    """
    B, T, C = x.shape
    n_head, _, H = wq.shape
    assert n_head * H == C
    out_dtype = x.dtype
    mm = matmul_dtype if matmul_dtype is not None else x.dtype

    # 256-row tiles for v6e/v7x; pass 128 on v5e. Must divide T.
    if q_block is None:
        q_block = min(T, 256)
    if kv_block is None:
        kv_block = min(T, 256)
    assert T % q_block == 0 and T % kv_block == 0

    # Pack heads along the output dim: (n_head, C, H) -> (C, C); head h occupies
    # columns [h*H, (h+1)*H) (matches torch.cat head order).
    def pack(w):
        return jnp.transpose(w, (1, 0, 2)).reshape(C, C).astype(mm)

    wq_all, wk_all, wv_all = pack(wq), pack(wk), pack(wv)
    wp_mm = wp.astype(mm)
    bp2 = bp.reshape(1, C).astype(jnp.float32)
    x_mm = x.astype(mm)

    n_q = T // q_block
    n_kv = T // kv_block
    kernel = functools.partial(_mha_flash_kernel, n_head=n_head,
                               q_block=q_block, kv_block=kv_block)

    out = pl.pallas_call(
        kernel,
        out_shape=jax.ShapeDtypeStruct((B, T, C), out_dtype),
        grid_spec=pltpu.PrefetchScalarGridSpec(
            num_scalar_prefetch=0,
            grid=(B, n_q, n_kv),
            in_specs=[
                pl.BlockSpec((1, q_block, C), lambda b, qi, ki: (b, qi, 0)),
                pl.BlockSpec((1, kv_block, C), lambda b, qi, ki: (b, ki, 0)),
                pl.BlockSpec((C, C), lambda b, qi, ki: (0, 0)),   # Wq packed
                pl.BlockSpec((C, C), lambda b, qi, ki: (0, 0)),   # Wk packed
                pl.BlockSpec((C, C), lambda b, qi, ki: (0, 0)),   # Wv packed
                pl.BlockSpec((C, C), lambda b, qi, ki: (0, 0)),   # Wp
                pl.BlockSpec((1, C), lambda b, qi, ki: (0, 0)),   # bias
            ],
            out_specs=pl.BlockSpec((1, q_block, C), lambda b, qi, ki: (b, qi, 0)),
            scratch_shapes=[
                pltpu.VMEM((q_block, C), mm),              # scaled projected q
                pltpu.VMEM((q_block, n_head), jnp.float32),  # running max
                pltpu.VMEM((q_block, n_head), jnp.float32),  # running denom
                pltpu.VMEM((q_block, C), jnp.float32),       # output accumulator
            ],
        ),
        compiler_params=pltpu.CompilerParams(
            dimension_semantics=("parallel", "parallel", "arbitrary"),
        ),
    )(x_mm, x_mm, wq_all, wk_all, wv_all, wp_mm, bp2)
    return out


def reference_mha(x, wq, wk, wv, wp, bp):
    """Pure-JAX reference mirroring the PyTorch forward (full f32 matmuls)."""
    B, T, C = x.shape
    n_head = wq.shape[0]
    with jax.default_matmul_precision("highest"):
        outs = []
        mask = jnp.tril(jnp.ones((T, T), dtype=bool))
        for h in range(n_head):
            q = x @ wq[h]
            k = x @ wk[h]
            v = x @ wv[h]
            wei = q @ jnp.swapaxes(k, -1, -2) / (C ** 0.5)
            wei = jnp.where(mask, wei, -jnp.inf)
            wei = jax.nn.softmax(wei, axis=-1)
            outs.append(wei @ v)
        cat = jnp.concatenate(outs, axis=-1)
        return cat @ wp + bp


if __name__ == "__main__":
    def make_inputs(key, B, T, C, n_head):
        H = C // n_head
        kx, kq, kk, kv, kp, kb = jax.random.split(key, 6)
        scale = 1.0 / (C ** 0.5)
        x = jax.random.normal(kx, (B, T, C), jnp.float32)
        wq = jax.random.normal(kq, (n_head, C, H), jnp.float32) * scale
        wk = jax.random.normal(kk, (n_head, C, H), jnp.float32) * scale
        wv = jax.random.normal(kv, (n_head, C, H), jnp.float32) * scale
        wp = jax.random.normal(kp, (C, C), jnp.float32) * scale
        bp = jax.random.normal(kb, (C,), jnp.float32) * scale
        return x, wq, wk, wv, wp, bp

    # 1) small, module-consistent shapes: B=2, T=block_size=8, n_embd=32, n_head=4
    args1 = make_inputs(jax.random.PRNGKey(0), 2, 8, 32, 4)
    out1 = jax.block_until_ready(multi_head_attention(*args1))
    ref1 = reference_mha(*args1)
    assert out1.shape == (2, 8, 32)
    assert jnp.allclose(out1, ref1, atol=2e-3, rtol=2e-3), "f32 mismatch (small)"

    # 2) multi-tile run exercising causal block skip / masked diagonal / unmasked paths
    args2 = make_inputs(jax.random.PRNGKey(1), 1, 64, 64, 2)
    out2 = jax.block_until_ready(
        multi_head_attention(*args2, q_block=32, kv_block=32))
    ref2 = reference_mha(*args2)
    assert jnp.allclose(out2, ref2, atol=2e-3, rtol=2e-3), "f32 mismatch (tiled)"

    # 3) bf16 MXU-operand fast path (production config) vs the f32 reference
    out3 = jax.block_until_ready(
        multi_head_attention(*args1, matmul_dtype=jnp.bfloat16))
    assert jnp.allclose(out3, ref1, atol=5e-2, rtol=5e-2), "bf16 mismatch"

    print("KERNEL_OK")
</pallas_src>

<mosaic_0001>
module attributes {stable_mosaic.version = 11 : i64} {
  func.func @_mha_flash_kernel(%arg0: i32, %arg1: i32, %arg2: i32, %arg3: memref<1x8x32xf32, #tpu.memory_space<vmem>>, %arg4: memref<1x8x32xf32, #tpu.memory_space<vmem>>, %arg5: memref<32x32xf32, #tpu.memory_space<vmem>>, %arg6: memref<32x32xf32, #tpu.memory_space<vmem>>, %arg7: memref<32x32xf32, #tpu.memory_space<vmem>>, %arg8: memref<32x32xf32, #tpu.memory_space<vmem>>, %arg9: memref<1x32xf32, #tpu.memory_space<vmem>>, %arg10: memref<1x8x32xf32, #tpu.memory_space<vmem>>, %arg11: memref<8x32xf32, #tpu.memory_space<vmem>>, %arg12: memref<8x4xf32, #tpu.memory_space<vmem>>, %arg13: memref<8x4xf32, #tpu.memory_space<vmem>>, %arg14: memref<8x32xf32, #tpu.memory_space<vmem>>) attributes {dimension_semantics = [#tpu.dimension_semantics<parallel>, #tpu.dimension_semantics<parallel>, #tpu.dimension_semantics<arbitrary>], iteration_bounds = array<i64: 2, 1, 1>, scalar_prefetch = 0 : i64, scratch_operands = 4 : i64, tpu.core_type = #tpu.core_type<tc>, window_params = [{transform_indices = @transform_0, window_bounds = array<i64: 1, 8, 32>}, {transform_indices = @transform_1, window_bounds = array<i64: 1, 8, 32>}, {pipeline_mode = #tpu.pipeline_mode<synchronous>, transform_indices = @transform_2, window_bounds = array<i64: 32, 32>}, {pipeline_mode = #tpu.pipeline_mode<synchronous>, transform_indices = @transform_3, window_bounds = array<i64: 32, 32>}, {pipeline_mode = #tpu.pipeline_mode<synchronous>, transform_indices = @transform_4, window_bounds = array<i64: 32, 32>}, {pipeline_mode = #tpu.pipeline_mode<synchronous>, transform_indices = @transform_5, window_bounds = array<i64: 32, 32>}, {pipeline_mode = #tpu.pipeline_mode<synchronous>, transform_indices = @transform_6, window_bounds = array<i64: 1, 32>}, {transform_indices = @transform_7, window_bounds = array<i64: 1, 8, 32>}]} {
    %c8_i32 = arith.constant 8 : i32
    %0 = arith.muli %arg1, %c8_i32 : i32
    %c7_i32 = arith.constant 7 : i32
    %1 = arith.addi %0, %c7_i32 : i32
    %c8_i32_0 = arith.constant 8 : i32
    %2 = arith.muli %arg2, %c8_i32_0 : i32
    %c7_i32_1 = arith.constant 7 : i32
    %3 = arith.addi %2, %c7_i32_1 : i32
    %c0_i32 = arith.constant 0 : i32
    %4 = arith.cmpi eq, %arg2, %c0_i32 : i32
    %5 = arith.extui %4 : i1 to i32
    %cst = arith.constant 0.176776692 : f32
    %c0_i32_2 = arith.constant 0 : i32
    %6 = arith.cmpi ne, %5, %c0_i32_2 : i32
    scf.if %6 {
      %c0 = arith.constant 0 : index
      %c0_6 = arith.constant 0 : index
      %c0_7 = arith.constant 0 : index
      %13 = vector.load %arg3[%c0, %c0_6, %c0_7] : memref<1x8x32xf32, #tpu.memory_space<vmem>>, vector<1x8x32xf32>
      %14 = vector.shape_cast %13 : vector<1x8x32xf32> to vector<8x32xf32>
      %c0_8 = arith.constant 0 : index
      %c0_9 = arith.constant 0 : index
      %15 = vector.load %arg5[%c0_8, %c0_9] : memref<32x32xf32, #tpu.memory_space<vmem>>, vector<32x32xf32>
      %cst_10 = arith.constant dense<0.000000e+00> : vector<8x32xf32>
      %16 = tpu.matmul %14, %15, %cst_10 {dimension_numbers = #tpu.dot_dimension_numbers<[1], [0], [0], [1], [0, 0, 1, 1], [], []>} : vector<8x32xf32>, vector<32x32xf32>, vector<8x32xf32> -> vector<8x32xf32>
      %17 = vector.broadcast %cst : f32 to vector<8x32xf32>
      %18 = arith.mulf %16, %17 : vector<8x32xf32>
      %c0_11 = arith.constant 0 : index
      %c0_12 = arith.constant 0 : index
      %19 = vector.load %arg11[%c0_11, %c0_12] : memref<8x32xf32, #tpu.memory_space<vmem>>, vector<8x32xf32>
      tpu.vector_store %arg11[%c0_11, %c0_12], %18 {strides = array<i32>} : memref<8x32xf32, #tpu.memory_space<vmem>>, vector<8x32xf32>,
      %cst_13 = arith.constant 0xFF800000 : f32
      %20 = vector.broadcast %cst_13 : f32 to vector<8x4xf32>
      %c0_14 = arith.constant 0 : index
      %c0_15 = arith.constant 0 : index
      %21 = vector.load %arg12[%c0_14, %c0_15] : memref<8x4xf32, #tpu.memory_space<vmem>>, vector<8x4xf32>
      tpu.vector_store %arg12[%c0_14, %c0_15], %20 {strides = array<i32>} : memref<8x4xf32, #tpu.memory_space<vmem>>, vector<8x4xf32>,
      %cst_16 = arith.constant 0.000000e+00 : f32
      %22 = vector.broadcast %cst_16 : f32 to vector<8x4xf32>
      %c0_17 = arith.constant 0 : index
      %c0_18 = arith.constant 0 : index
      %23 = vector.load %arg13[%c0_17, %c0_18] : memref<8x4xf32, #tpu.memory_space<vmem>>, vector<8x4xf32>
      tpu.vector_store %arg13[%c0_17, %c0_18], %22 {strides = array<i32>} : memref<8x4xf32, #tpu.memory_space<vmem>>, vector<8x4xf32>,
      %cst_19 = arith.constant 0.000000e+00 : f32
      %24 = vector.broadcast %cst_19 : f32 to vector<8x32xf32>
      %c0_20 = arith.constant 0 : index
      %c0_21 = arith.constant 0 : index
      %25 = vector.load %arg14[%c0_20, %c0_21] : memref<8x32xf32, #tpu.memory_space<vmem>>, vector<8x32xf32>
      tpu.vector_store %arg14[%c0_20, %c0_21], %24 {strides = array<i32>} : memref<8x32xf32, #tpu.memory_space<vmem>>, vector<8x32xf32>,
    } else {
    }
    %7 = arith.cmpi sle, %2, %1 : i32
    %8 = arith.extui %7 : i1 to i32
    %c0_i32_3 = arith.constant 0 : i32
    %9 = arith.cmpi ne, %8, %c0_i32_3 : i32
    scf.if %9 {
      %c0 = arith.constant 0 : index
      %c0_6 = arith.constant 0 : index
      %c0_7 = arith.constant 0 : index
      %13 = vector.load %arg4[%c0, %c0_6, %c0_7] : memref<1x8x32xf32, #tpu.memory_space<vmem>>, vector<1x8x32xf32>
      %14 = vector.shape_cast %13 : vector<1x8x32xf32> to vector<8x32xf32>
      %c0_8 = arith.constant 0 : index
      %c0_9 = arith.constant 0 : index
      %15 = vector.load %arg6[%c0_8, %c0_9] : memref<32x32xf32, #tpu.memory_space<vmem>>, vector<32x32xf32>
      %cst_10 = arith.constant dense<0.000000e+00> : vector<8x32xf32>
      %16 = tpu.matmul %14, %15, %cst_10 {dimension_numbers = #tpu.dot_dimension_numbers<[1], [0], [0], [1], [0, 0, 1, 1], [], []>} : vector<8x32xf32>, vector<32x32xf32>, vector<8x32xf32> -> vector<8x32xf32>
      %c0_11 = arith.constant 0 : index
      %c0_12 = arith.constant 0 : index
      %c0_13 = arith.constant 0 : index
      %17 = vector.load %arg4[%c0_11, %c0_12, %c0_13] : memref<1x8x32xf32, #tpu.memory_space<vmem>>, vector<1x8x32xf32>
      %18 = vector.shape_cast %17 : vector<1x8x32xf32> to vector<8x32xf32>
      %c0_14 = arith.constant 0 : index
      %c0_15 = arith.constant 0 : index
      %19 = vector.load %arg7[%c0_14, %c0_15] : memref<32x32xf32, #tpu.memory_space<vmem>>, vector<32x32xf32>
      %cst_16 = arith.constant dense<0.000000e+00> : vector<8x32xf32>
      %20 = tpu.matmul %18, %19, %cst_16 {dimension_numbers = #tpu.dot_dimension_numbers<[1], [0], [0], [1], [0, 0, 1, 1], [], []>} : vector<8x32xf32>, vector<32x32xf32>, vector<8x32xf32> -> vector<8x32xf32>
      %c0_17 = arith.constant 0 : index
      %c0_18 = arith.constant 0 : index
      %21 = vector.load %arg11[%c0_17, %c0_18] : memref<8x32xf32, #tpu.memory_space<vmem>>, vector<8x32xf32>
      %22 = arith.cmpi sle, %3, %0 : i32
      %23 = arith.extui %22 : i1 to i32
      %c0_i32_19 = arith.constant 0 : i32
      %24 = arith.cmpi ne, %23, %c0_i32_19 : i32
      scf.if %24 {
        %28 = vector.extract_strided_slice %21 {offsets = [0, 0], sizes = [8, 8], strides = [1, 1]} : vector<8x32xf32> to vector<8x8xf32>
        %29 = vector.extract_strided_slice %16 {offsets = [0, 0], sizes = [8, 8], strides = [1, 1]} : vector<8x32xf32> to vector<8x8xf32>
        %cst_21 = arith.constant dense<0.000000e+00> : vector<8x8xf32>
        %30 = tpu.matmul %28, %29, %cst_21 {dimension_numbers = #tpu.dot_dimension_numbers<[1], [1], [0], [0], [0, 0, 1, 0], [], []>} : vector<8x8xf32>, vector<8x8xf32>, vector<8x8xf32> -> vector<8x8xf32>
        %c0_22 = arith.constant 0 : index
        %c0_23 = arith.constant 0 : index
        %31 = vector.load %arg12[%c0_22, %c0_23] : memref<8x4xf32, #tpu.memory_space<vmem>>, vector<8x1xf32>
        %cst_24 = arith.constant dense<0xFF800000> : vector<8xf32>
        %32 = vector.multi_reduction <maximumf>, %30, %cst_24 [1] : vector<8x8xf32> to vector<8xf32>
        %33 = vector.shape_cast %32 : vector<8xf32> to vector<8x1xf32>
        %34 = arith.maximumf %31, %33 : vector<8x1xf32>
        %35 = arith.subf %31, %34 : vector<8x1xf32>
        %36 = math.exp %35 : vector<8x1xf32>
        %37 = vector.broadcast %34 : vector<8x1xf32> to vector<8x8xf32>
        %38 = arith.subf %30, %37 : vector<8x8xf32>
        %39 = math.exp %38 : vector<8x8xf32>
        %c0_25 = arith.constant 0 : index
        %c0_26 = arith.constant 0 : index
        %40 = vector.load %arg13[%c0_25, %c0_26] : memref<8x4xf32, #tpu.memory_space<vmem>>, vector<8x1xf32>
        %41 = arith.mulf %36, %40 : vector<8x1xf32>
        %cst_27 = arith.constant dense<0.000000e+00> : vector<8xf32>
        %42 = vector.multi_reduction <add>, %39, %cst_27 [1] : vector<8x8xf32> to vector<8xf32>
        %43 = vector.shape_cast %42 : vector<8xf32> to vector<8x1xf32>
        %44 = arith.addf %41, %43 : vector<8x1xf32>
        %c0_28 = arith.constant 0 : index
        %c0_29 = arith.constant 0 : index
        %45 = vector.load %arg13[%c0_28, %c0_29] : memref<8x4xf32, #tpu.memory_space<vmem>>, vector<8x1xf32>
        tpu.vector_store %arg13[%c0_28, %c0_29], %44 {strides = array<i32>} : memref<8x4xf32, #tpu.memory_space<vmem>>, vector<8x1xf32>,
        %46 = vector.extract_strided_slice %20 {offsets = [0, 0], sizes = [8, 8], strides = [1, 1]} : vector<8x32xf32> to vector<8x8xf32>
        %cst_30 = arith.constant dense<0.000000e+00> : vector<8x8xf32>
        %47 = tpu.matmul %39, %46, %cst_30 {dimension_numbers = #tpu.dot_dimension_numbers<[1], [0], [0], [1], [0, 0, 1, 1], [], []>} : vector<8x8xf32>, vector<8x8xf32>, vector<8x8xf32> -> vector<8x8xf32>
        %c0_31 = arith.constant 0 : index
        %c0_32 = arith.constant 0 : index
        %48 = vector.load %arg14[%c0_31, %c0_32] : memref<8x32xf32, #tpu.memory_space<vmem>>, vector<8x8xf32>
        %49 = vector.broadcast %36 : vector<8x1xf32> to vector<8x8xf32>
        %50 = arith.mulf %49, %48 : vector<8x8xf32>
        %51 = arith.addf %50, %47 : vector<8x8xf32>
        %c0_33 = arith.constant 0 : index
        %c0_34 = arith.constant 0 : index
        %52 = vector.load %arg14[%c0_33, %c0_34] : memref<8x32xf32, #tpu.memory_space<vmem>>, vector<8x8xf32>
        tpu.vector_store %arg14[%c0_33, %c0_34], %51 {strides = array<i32>} : memref<8x32xf32, #tpu.memory_space<vmem>>, vector<8x8xf32>,
        %c0_35 = arith.constant 0 : index
        %c0_36 = arith.constant 0 : index
        %53 = vector.load %arg12[%c0_35, %c0_36] : memref<8x4xf32, #tpu.memory_space<vmem>>, vector<8x1xf32>
        tpu.vector_store %arg12[%c0_35, %c0_36], %34 {strides = array<i32>} : memref<8x4xf32, #tpu.memory_space<vmem>>, vector<8x1xf32>,
        %54 = vector.extract_strided_slice %21 {offsets = [0, 8], sizes = [8, 8], strides = [1, 1]} : vector<8x32xf32> to vector<8x8xf32>
        %55 = vector.extract_strided_slice %16 {offsets = [0, 8], sizes = [8, 8], strides = [1, 1]} : vector<8x32xf32> to vector<8x8xf32>
        %cst_37 = arith.constant dense<0.000000e+00> : vector<8x8xf32>
        %56 = tpu.matmul %54, %55, %cst_37 {dimension_numbers = #tpu.dot_dimension_numbers<[1], [1], [0], [0], [0, 0, 1, 0], [], []>} : vector<8x8xf32>, vector<8x8xf32>, vector<8x8xf32> -> vector<8x8xf32>
        %c0_38 = arith.constant 0 : index
        %c1 = arith.constant 1 : index
        %57 = vector.load %arg12[%c0_38, %c1] : memref<8x4xf32, #tpu.memory_space<vmem>>, vector<8x1xf32>
        %cst_39 = arith.constant dense<0xFF800000> : vector<8xf32>
        %58 = vector.multi_reduction <maximumf>, %56, %cst_39 [1] : vector<8x8xf32> to vector<8xf32>
        %59 = vector.shape_cast %58 : vector<8xf32> to vector<8x1xf32>
        %60 = arith.maximumf %57, %59 : vector<8x1xf32>
        %61 = arith.subf %57, %60 : vector<8x1xf32>
        %62 = math.exp %61 : vector<8x1xf32>
        %63 = vector.broadcast %60 : vector<8x1xf32> to vector<8x8xf32>
        %64 = arith.subf %56, %63 : vector<8x8xf32>
        %65 = math.exp %64 : vector<8x8xf32>
        %c0_40 = arith.constant 0 : index
        %c1_41 = arith.constant 1 : index
        %66 = vector.load %arg13[%c0_40, %c1_41] : memref<8x4xf32, #tpu.memory_space<vmem>>, vector<8x1xf32>
        %67 = arith.mulf %62, %66 : vector<8x1xf32>
        %cst_42 = arith.constant dense<0.000000e+00> : vector<8xf32>
        %68 = vector.multi_reduction <add>, %65, %cst_42 [1] : vector<8x8xf32> to vector<8xf32>
        %69 = vector.shape_cast %68 : vector<8xf32> to vector<8x1xf32>
        %70 = arith.addf %67, %69 : vector<8x1xf32>
        %c0_43 = arith.constant 0 : index
        %c1_44 = arith.constant 1 : index
        %71 = vector.load %arg13[%c0_43, %c1_44] : memref<8x4xf32, #tpu.memory_space<vmem>>, vector<8x1xf32>
        tpu.vector_store %arg13[%c0_43, %c1_44], %70 {strides = array<i32>} : memref<8x4xf32, #tpu.memory_space<vmem>>, vector<8x1xf32>,
        %72 = vector.extract_strided_slice %20 {offsets = [0, 8], sizes = [8, 8], strides = [1, 1]} : vector<8x32xf32> to vector<8x8xf32>
        %cst_45 = arith.constant dense<0.000000e+00> : vector<8x8xf32>
        %73 = tpu.matmul %65, %72, %cst_45 {dimension_numbers = #tpu.dot_dimension_numbers<[1], [0], [0], [1], [0, 0, 1, 1], [], []>} : vector<8x8xf32>, vector<8x8xf32>, vector<8x8xf32> -> vector<8x8xf32>
        %c0_46 = arith.constant 0 : index
        %c8 = arith.constant 8 : index
        %74 = vector.load %arg14[%c0_46, %c8] : memref<8x32xf32, #tpu.memory_space<vmem>>, vector<8x8xf32>
        %75 = vector.broadcast %62 : vector<8x1xf32> to vector<8x8xf32>
        %76 = arith.mulf %75, %74 : vector<8x8xf32>
        %77 = arith.addf %76, %73 : vector<8x8xf32>
        %c0_47 = arith.constant 0 : index
        %c8_48 = arith.constant 8 : index
        %78 = vector.load %arg14[%c0_47, %c8_48] : memref<8x32xf32, #tpu.memory_space<vmem>>, vector<8x8xf32>
        tpu.vector_store %arg14[%c0_47, %c8_48], %77 {strides = array<i32>} : memref<8x32xf32, #tpu.memory_space<vmem>>, vector<8x8xf32>,
        %c0_49 = arith.constant 0 : index
        %c1_50 = arith.constant 1 : index
        %79 = vector.load %arg12[%c0_49, %c1_50] : memref<8x4xf32, #tpu.memory_space<vmem>>, vector<8x1xf32>
        tpu.vector_store %arg12[%c0_49, %c1_50], %60 {strides = array<i32>} : memref<8x4xf32, #tpu.memory_space<vmem>>, vector<8x1xf32>,
        %80 = vector.extract_strided_slice %21 {offsets = [0, 16], sizes = [8, 8], strides = [1, 1]} : vector<8x32xf32> to vector<8x8xf32>
        %81 = vector.extract_strided_slice %16 {offsets = [0, 16], sizes = [8, 8], strides = [1, 1]} : vector<8x32xf32> to vector<8x8xf32>
        %cst_51 = arith.constant dense<0.000000e+00> : vector<8x8xf32>
        %82 = tpu.matmul %80, %81, %cst_51 {dimension_numbers = #tpu.dot_dimension_numbers<[1], [1], [0], [0], [0, 0, 1, 0], [], []>} : vector<8x8xf32>, vector<8x8xf32>, vector<8x8xf32> -> vector<8x8xf32>
        %c0_52 = arith.constant 0 : index
        %c2 = arith.constant 2 : index
        %83 = vector.load %arg12[%c0_52, %c2] : memref<8x4xf32, #tpu.memory_space<vmem>>, vector<8x1xf32>
        %cst_53 = arith.constant dense<0xFF800000> : vector<8xf32>
        %84 = vector.multi_reduction <maximumf>, %82, %cst_53 [1] : vector<8x8xf32> to vector<8xf32>
        %85 = vector.shape_cast %84 : vector<8xf32> to vector<8x1xf32>
        %86 = arith.maximumf %83, %85 : vector<8x1xf32>
        %87 = arith.subf %83, %86 : vector<8x1xf32>
        %88 = math.exp %87 : vector<8x1xf32>
        %89 = vector.broadcast %86 : vector<8x1xf32> to vector<8x8xf32>
        %90 = arith.subf %82, %89 : vector<8x8xf32>
        %91 = math.exp %90 : vector<8x8xf32>
        %c0_54 = arith.constant 0 : index
        %c2_55 = arith.constant 2 : index
        %92 = vector.load %arg13[%c0_54, %c2_55] : memref<8x4xf32, #tpu.memory_space<vmem>>, vector<8x1xf32>
        %93 = arith.mulf %88, %92 : vector<8x1xf32>
        %cst_56 = arith.constant dense<0.000000e+00> : vector<8xf32>
        %94 = vector.multi_reduction <add>, %91, %cst_56 [1] : vector<8x8xf32> to vector<8xf32>
        %95 = vector.shape_cast %94 : vector<8xf32> to vector<8x1xf32>
        %96 = arith.addf %93, %95 : vector<8x1xf32>
        %c0_57 = arith.constant 0 : index
        %c2_58 = arith.constant 2 : index
        %97 = vector.load %arg13[%c0_57, %c2_58] : memref<8x4xf32, #tpu.memory_space<vmem>>, vector<8x1xf32>
        tpu.vector_store %arg13[%c0_57, %c2_58], %96 {strides = array<i32>} : memref<8x4xf32, #tpu.memory_space<vmem>>, vector<8x1xf32>,
        %98 = vector.extract_strided_slice %20 {offsets = [0, 16], sizes = [8, 8], strides = [1, 1]} : vector<8x32xf32> to vector<8x8xf32>
        %cst_59 = arith.constant dense<0.000000e+00> : vector<8x8xf32>
        %99 = tpu.matmul %91, %98, %cst_59 {dimension_numbers = #tpu.dot_dimension_numbers<[1], [0], [0], [1], [0, 0, 1, 1], [], []>} : vector<8x8xf32>, vector<8x8xf32>, vector<8x8xf32> -> vector<8x8xf32>
        %c0_60 = arith.constant 0 : index
        %c16 = arith.constant 16 : index
        %100 = vector.load %arg14[%c0_60, %c16] : memref<8x32xf32, #tpu.memory_space<vmem>>, vector<8x8xf32>
        %101 = vector.broadcast %88 : vector<8x1xf32> to vector<8x8xf32>
        %102 = arith.mulf %101, %100 : vector<8x8xf32>
        %103 = arith.addf %102, %99 : vector<8x8xf32>
        %c0_61 = arith.constant 0 : index
        %c16_62 = arith.constant 16 : index
        %104 = vector.load %arg14[%c0_61, %c16_62] : memref<8x32xf32, #tpu.memory_space<vmem>>, vector<8x8xf32>
        tpu.vector_store %arg14[%c0_61, %c16_62], %103 {strides = array<i32>} : memref<8x32xf32, #tpu.memory_space<vmem>>, vector<8x8xf32>,
        %c0_63 = arith.constant 0 : index
        %c2_64 = arith.constant 2 : index
        %105 = vector.load %arg12[%c0_63, %c2_64] : memref<8x4xf32, #tpu.memory_space<vmem>>, vector<8x1xf32>
        tpu.vector_store %arg12[%c0_63, %c2_64], %86 {strides = array<i32>} : memref<8x4xf32, #tpu.memory_space<vmem>>, vector<8x1xf32>,
        %106 = vector.extract_strided_slice %21 {offsets = [0, 24], sizes = [8, 8], strides = [1, 1]} : vector<8x32xf32> to vector<8x8xf32>
        %107 = vector.extract_strided_slice %16 {offsets = [0, 24], sizes = [8, 8], strides = [1, 1]} : vector<8x32xf32> to vector<8x8xf32>
        %cst_65 = arith.constant dense<0.000000e+00> : vector<8x8xf32>
        %108 = tpu.matmul %106, %107, %cst_65 {dimension_numbers = #tpu.dot_dimension_numbers<[1], [1], [0], [0], [0, 0, 1, 0], [], []>} : vector<8x8xf32>, vector<8x8xf32>, vector<8x8xf32> -> vector<8x8xf32>
        %c0_66 = arith.constant 0 : index
        %c3 = arith.constant 3 : index
        %109 = vector.load %arg12[%c0_66, %c3] : memref<8x4xf32, #tpu.memory_space<vmem>>, vector<8x1xf32>
        %cst_67 = arith.constant dense<0xFF800000> : vector<8xf32>
        %110 = vector.multi_reduction <maximumf>, %108, %cst_67 [1] : vector<8x8xf32> to vector<8xf32>
        %111 = vector.shape_cast %110 : vector<8xf32> to vector<8x1xf32>
        %112 = arith.maximumf %109, %111 : vector<8x1xf32>
        %113 = arith.subf %109, %112 : vector<8x1xf32>
        %114 = math.exp %113 : vector<8x1xf32>
        %115 = vector.broadcast %112 : vector<8x1xf32> to vector<8x8xf32>
        %116 = arith.subf %108, %115 : vector<8x8xf32>
        %117 = math.exp %116 : vector<8x8xf32>
        %c0_68 = arith.constant 0 : index
        %c3_69 = arith.constant 3 : index
        %118 = vector.load %arg13[%c0_68, %c3_69] : memref<8x4xf32, #tpu.memory_space<vmem>>, vector<8x1xf32>
        %119 = arith.mulf %114, %118 : vector<8x1xf32>
        %cst_70 = arith.constant dense<0.000000e+00> : vector<8xf32>
        %120 = vector.multi_reduction <add>, %117, %cst_70 [1] : vector<8x8xf32> to vector<8xf32>
        %121 = vector.shape_cast %120 : vector<8xf32> to vector<8x1xf32>
        %122 = arith.addf %119, %121 : vector<8x1xf32>
        %c0_71 = arith.constant 0 : index
        %c3_72 = arith.constant 3 : index
        %123 = vector.load %arg13[%c0_71, %c3_72] : memref<8x4xf32, #tpu.memory_space<vmem>>, vector<8x1xf32>
        tpu.vector_store %arg13[%c0_71, %c3_72], %122 {strides = array<i32>} : memref<8x4xf32, #tpu.memory_space<vmem>>, vector<8x1xf32>,
        %124 = vector.extract_strided_slice %20 {offsets = [0, 24], sizes = [8, 8], strides = [1, 1]} : vector<8x32xf32> to vector<8x8xf32>
        %cst_73 = arith.constant dense<0.000000e+00> : vector<8x8xf32>
        %125 = tpu.matmul %117, %124, %cst_73 {dimension_numbers = #tpu.dot_dimension_numbers<[1], [0], [0], [1], [0, 0, 1, 1], [], []>} : vector<8x8xf32>, vector<8x8xf32>, vector<8x8xf32> -> vector<8x8xf32>
        %c0_74 = arith.constant 0 : index
        %c24 = arith.constant 24 : index
        %126 = vector.load %arg14[%c0_74, %c24] : memref<8x32xf32, #tpu.memory_space<vmem>>, vector<8x8xf32>
        %127 = vector.broadcast %114 : vector<8x1xf32> to vector<8x8xf32>
        %128 = arith.mulf %127, %126 : vector<8x8xf32>
        %129 = arith.addf %128, %125 : vector<8x8xf32>
        %c0_75 = arith.constant 0 : index
        %c24_76 = arith.constant 24 : index
        %130 = vector.load %arg14[%c0_75, %c24_76] : memref<8x32xf32, #tpu.memory_space<vmem>>, vector<8x8xf32>
        tpu.vector_store %arg14[%c0_75, %c24_76], %129 {strides = array<i32>} : memref<8x32xf32, #tpu.memory_space<vmem>>, vector<8x8xf32>,
        %c0_77 = arith.constant 0 : index
        %c3_78 = arith.constant 3 : index
        %131 = vector.load %arg12[%c0_77, %c3_78] : memref<8x4xf32, #tpu.memory_space<vmem>>, vector<8x1xf32>
        tpu.vector_store %arg12[%c0_77, %c3_78], %112 {strides = array<i32>} : memref<8x4xf32, #tpu.memory_space<vmem>>, vector<8x1xf32>,
      } else {
      }
      %25 = arith.cmpi sgt, %3, %0 : i32
      %26 = arith.extui %25 : i1 to i32
      %c0_i32_20 = arith.constant 0 : i32
      %27 = arith.cmpi ne, %26, %c0_i32_20 : i32
      scf.if %27 {
        %28 = tpu.iota {dimensions = array<i32: 0>} : vector<8x8xi32>
        %29 = vector.broadcast %0 : i32 to vector<8x8xi32>
        %30 = arith.addi %29, %28 : vector<8x8xi32>
        %31 = tpu.iota {dimensions = array<i32: 1>} : vector<8x8xi32>
        %32 = vector.broadcast %2 : i32 to vector<8x8xi32>
        %33 = arith.addi %32, %31 : vector<8x8xi32>
        %34 = arith.cmpi sle, %33, %30 : vector<8x8xi32>
        %35 = vector.extract_strided_slice %21 {offsets = [0, 0], sizes = [8, 8], strides = [1, 1]} : vector<8x32xf32> to vector<8x8xf32>
        %36 = vector.extract_strided_slice %16 {offsets = [0, 0], sizes = [8, 8], strides = [1, 1]} : vector<8x32xf32> to vector<8x8xf32>
        %cst_21 = arith.constant dense<0.000000e+00> : vector<8x8xf32>
        %37 = tpu.matmul %35, %36, %cst_21 {dimension_numbers = #tpu.dot_dimension_numbers<[1], [1], [0], [0], [0, 0, 1, 0], [], []>} : vector<8x8xf32>, vector<8x8xf32>, vector<8x8xf32> -> vector<8x8xf32>
        %cst_22 = arith.constant -1.000000e+30 : f32
        %38 = vector.broadcast %cst_22 : f32 to vector<8x8xf32>
        %39 = arith.select %34, %37, %38 : vector<8x8xi1>, vector<8x8xf32>
        %c0_23 = arith.constant 0 : index
        %c0_24 = arith.constant 0 : index
        %40 = vector.load %arg12[%c0_23, %c0_24] : memref<8x4xf32, #tpu.memory_space<vmem>>, vector<8x1xf32>
        %cst_25 = arith.constant dense<0xFF800000> : vector<8xf32>
        %41 = vector.multi_reduction <maximumf>, %39, %cst_25 [1] : vector<8x8xf32> to vector<8xf32>
        %42 = vector.shape_cast %41 : vector<8xf32> to vector<8x1xf32>
        %43 = arith.maximumf %40, %42 : vector<8x1xf32>
        %44 = arith.subf %40, %43 : vector<8x1xf32>
        %45 = math.exp %44 : vector<8x1xf32>
        %46 = vector.broadcast %43 : vector<8x1xf32> to vector<8x8xf32>
        %47 = arith.subf %39, %46 : vector<8x8xf32>
        %48 = math.exp %47 : vector<8x8xf32>
        %c0_26 = arith.constant 0 : index
        %c0_27 = arith.constant 0 : index
        %49 = vector.load %arg13[%c0_26, %c0_27] : memref<8x4xf32, #tpu.memory_space<vmem>>, vector<8x1xf32>
        %50 = arith.mulf %45, %49 : vector<8x1xf32>
        %cst_28 = arith.constant dense<0.000000e+00> : vector<8xf32>
        %51 = vector.multi_reduction <add>, %48, %cst_28 [1] : vector<8x8xf32> to vector<8xf32>
        %52 = vector.shape_cast %51 : vector<8xf32> to vector<8x1xf32>
        %53 = arith.addf %50, %52 : vector<8x1xf32>
        %c0_29 = arith.constant 0 : index
        %c0_30 = arith.constant 0 : index
        %54 = vector.load %arg13[%c0_29, %c0_30] : memref<8x4xf32, #tpu.memory_space<vmem>>, vector<8x1xf32>
        tpu.vector_store %arg13[%c0_29, %c0_30], %53 {strides = array<i32>} : memref<8x4xf32, #tpu.memory_space<vmem>>, vector<8x1xf32>,
        %55 = vector.extract_strided_slice %20 {offsets = [0, 0], sizes = [8, 8], strides = [1, 1]} : vector<8x32xf32> to vector<8x8xf32>
        %cst_31 = arith.constant dense<0.000000e+00> : vector<8x8xf32>
        %56 = tpu.matmul %48, %55, %cst_31 {dimension_numbers = #tpu.dot_dimension_numbers<[1], [0], [0], [1], [0, 0, 1, 1], [], []>} : vector<8x8xf32>, vector<8x8xf32>, vector<8x8xf32> -> vector<8x8xf32>
        %c0_32 = arith.constant 0 : index
        %c0_33 = arith.constant 0 : index
        %57 = vector.load %arg14[%c0_32, %c0_33] : memref<8x32xf32, #tpu.memory_space<vmem>>, vector<8x8xf32>
        %58 = vector.broadcast %45 : vector<8x1xf32> to vector<8x8xf32>
        %59 = arith.mulf %58, %57 : vector<8x8xf32>
        %60 = arith.addf %59, %56 : vector<8x8xf32>
        %c0_34 = arith.constant 0 : index
        %c0_35 = arith.constant 0 : index
        %61 = vector.load %arg14[%c0_34, %c0_35] : memref<8x32xf32, #tpu.memory_space<vmem>>, vector<8x8xf32>
        tpu.vector_store %arg14[%c0_34, %c0_35], %60 {strides = array<i32>} : memref<8x32xf32, #tpu.memory_space<vmem>>, vector<8x8xf32>,
        %c0_36 = arith.constant 0 : index
        %c0_37 = arith.constant 0 : index
        %62 = vector.load %arg12[%c0_36, %c0_37] : memref<8x4xf32, #tpu.memory_space<vmem>>, vector<8x1xf32>
        tpu.vector_store %arg12[%c0_36, %c0_37], %43 {strides = array<i32>} : memref<8x4xf32, #tpu.memory_space<vmem>>, vector<8x1xf32>,
        %63 = vector.extract_strided_slice %21 {offsets = [0, 8], sizes = [8, 8], strides = [1, 1]} : vector<8x32xf32> to vector<8x8xf32>
        %64 = vector.extract_strided_slice %16 {offsets = [0, 8], sizes = [8, 8], strides = [1, 1]} : vector<8x32xf32> to vector<8x8xf32>
        %cst_38 = arith.constant dense<0.000000e+00> : vector<8x8xf32>
        %65 = tpu.matmul %63, %64, %cst_38 {dimension_numbers = #tpu.dot_dimension_numbers<[1], [1], [0], [0], [0, 0, 1, 0], [], []>} : vector<8x8xf32>, vector<8x8xf32>, vector<8x8xf32> -> vector<8x8xf32>
        %cst_39 = arith.constant -1.000000e+30 : f32
        %66 = vector.broadcast %cst_39 : f32 to vector<8x8xf32>
        %67 = arith.select %34, %65, %66 : vector<8x8xi1>, vector<8x8xf32>
        %c0_40 = arith.constant 0 : index
        %c1 = arith.constant 1 : index
        %68 = vector.load %arg12[%c0_40, %c1] : memref<8x4xf32, #tpu.memory_space<vmem>>, vector<8x1xf32>
        %cst_41 = arith.constant dense<0xFF800000> : vector<8xf32>
        %69 = vector.multi_reduction <maximumf>, %67, %cst_41 [1] : vector<8x8xf32> to vector<8xf32>
        %70 = vector.shape_cast %69 : vector<8xf32> to vector<8x1xf32>
        %71 = arith.maximumf %68, %70 : vector<8x1xf32>
        %72 = arith.subf %68, %71 : vector<8x1xf32>
        %73 = math.exp %72 : vector<8x1xf32>
        %74 = vector.broadcast %71 : vector<8x1xf32> to vector<8x8xf32>
        %75 = arith.subf %67, %74 : vector<8x8xf32>
        %76 = math.exp %75 : vector<8x8xf32>
        %c0_42 = arith.constant 0 : index
        %c1_43 = arith.constant 1 : index
        %77 = vector.load %arg13[%c0_42, %c1_43] : memref<8x4xf32, #tpu.memory_space<vmem>>, vector<8x1xf32>
        %78 = arith.mulf %73, %77 : vector<8x1xf32>
        %cst_44 = arith.constant dense<0.000000e+00> : vector<8xf32>
        %79 = vector.multi_reduction <add>, %76, %cst_44 [1] : vector<8x8xf32> to vector<8xf32>
        %80 = vector.shape_cast %79 : vector<8xf32> to vector<8x1xf32>
        %81 = arith.addf %78, %80 : vector<8x1xf32>
        %c0_45 = arith.constant 0 : index
        %c1_46 = arith.constant 1 : index
        %82 = vector.load %arg13[%c0_45, %c1_46] : memref<8x4xf32, #tpu.memory_space<vmem>>, vector<8x1xf32>
        tpu.vector_store %arg13[%c0_45, %c1_46], %81 {strides = array<i32>} : memref<8x4xf32, #tpu.memory_space<vmem>>, vector<8x1xf32>,
        %83 = vector.extract_strided_slice %20 {offsets = [0, 8], sizes = [8, 8], strides = [1, 1]} : vector<8x32xf32> to vector<8x8xf32>
        %cst_47 = arith.constant dense<0.000000e+00> : vector<8x8xf32>
        %84 = tpu.matmul %76, %83, %cst_47 {dimension_numbers = #tpu.dot_dimension_numbers<[1], [0], [0], [1], [0, 0, 1, 1], [], []>} : vector<8x8xf32>, vector<8x8xf32>, vector<8x8xf32> -> vector<8x8xf32>
        %c0_48 = arith.constant 0 : index
        %c8 = arith.constant 8 : index
        %85 = vector.load %arg14[%c0_48, %c8] : memref<8x32xf32, #tpu.memory_space<vmem>>, vector<8x8xf32>
        %86 = vector.broadcast %73 : vector<8x1xf32> to vector<8x8xf32>
        %87 = arith.mulf %86, %85 : vector<8x8xf32>
        %88 = arith.addf %87, %84 : vector<8x8xf32>
        %c0_49 = arith.constant 0 : index
        %c8_50 = arith.constant 8 : index
        %89 = vector.load %arg14[%c0_49, %c8_50] : memref<8x32xf32, #tpu.memory_space<vmem>>, vector<8x8xf32>
        tpu.vector_store %arg14[%c0_49, %c8_50], %88 {strides = array<i32>} : memref<8x32xf32, #tpu.memory_space<vmem>>, vector<8x8xf32>,
        %c0_51 = arith.constant 0 : index
        %c1_52 = arith.constant 1 : index
        %90 = vector.load %arg12[%c0_51, %c1_52] : memref<8x4xf32, #tpu.memory_space<vmem>>, vector<8x1xf32>
        tpu.vector_store %arg12[%c0_51, %c1_52], %71 {strides = array<i32>} : memref<8x4xf32, #tpu.memory_space<vmem>>, vector<8x1xf32>,
        %91 = vector.extract_strided_slice %21 {offsets = [0, 16], sizes = [8, 8], strides = [1, 1]} : vector<8x32xf32> to vector<8x8xf32>
        %92 = vector.extract_strided_slice %16 {offsets = [0, 16], sizes = [8, 8], strides = [1, 1]} : vector<8x32xf32> to vector<8x8xf32>
        %cst_53 = arith.constant dense<0.000000e+00> : vector<8x8xf32>
        %93 = tpu.matmul %91, %92, %cst_53 {dimension_numbers = #tpu.dot_dimension_numbers<[1], [1], [0], [0], [0, 0, 1, 0], [], []>} : vector<8x8xf32>, vector<8x8xf32>, vector<8x8xf32> -> vector<8x8xf32>
        %cst_54 = arith.constant -1.000000e+30 : f32
        %94 = vector.broadcast %cst_54 : f32 to vector<8x8xf32>
        %95 = arith.select %34, %93, %94 : vector<8x8xi1>, vector<8x8xf32>
        %c0_55 = arith.constant 0 : index
        %c2 = arith.constant 2 : index
        %96 = vector.load %arg12[%c0_55, %c2] : memref<8x4xf32, #tpu.memory_space<vmem>>, vector<8x1xf32>
        %cst_56 = arith.constant dense<0xFF800000> : vector<8xf32>
        %97 = vector.multi_reduction <maximumf>, %95, %cst_56 [1] : vector<8x8xf32> to vector<8xf32>
        %98 = vector.shape_cast %97 : vector<8xf32> to vector<8x1xf32>
        %99 = arith.maximumf %96, %98 : vector<8x1xf32>
        %100 = arith.subf %96, %99 : vector<8x1xf32>
        %101 = math.exp %100 : vector<8x1xf32>
        %102 = vector.broadcast %99 : vector<8x1xf32> to vector<8x8xf32>
        %103 = arith.subf %95, %102 : vector<8x8xf32>
        %104 = math.exp %103 : vector<8x8xf32>
        %c0_57 = arith.constant 0 : index
        %c2_58 = arith.constant 2 : index
        %105 = vector.load %arg13[%c0_57, %c2_58] : memref<8x4xf32, #tpu.memory_space<vmem>>, vector<8x1xf32>
        %106 = arith.mulf %101, %105 : vector<8x1xf32>
        %cst_59 = arith.constant dense<0.000000e+00> : vector<8xf32>
        %107 = vector.multi_reduction <add>, %104, %cst_59 [1] : vector<8x8xf32> to vector<8xf32>
        %108 = vector.shape_cast %107 : vector<8xf32> to vector<8x1xf32>
        %109 = arith.addf %106, %108 : vector<8x1xf32>
        %c0_60 = arith.constant 0 : index
        %c2_61 = arith.constant 2 : index
        %110 = vector.load %arg13[%c0_60, %c2_61] : memref<8x4xf32, #tpu.memory_space<vmem>>, vector<8x1xf32>
        tpu.vector_store %arg13[%c0_60, %c2_61], %109 {strides = array<i32>} : memref<8x4xf32, #tpu.memory_space<vmem>>, vector<8x1xf32>,
        %111 = vector.extract_strided_slice %20 {offsets = [0, 16], sizes = [8, 8], strides = [1, 1]} : vector<8x32xf32> to vector<8x8xf32>
        %cst_62 = arith.constant dense<0.000000e+00> : vector<8x8xf32>
        %112 = tpu.matmul %104, %111, %cst_62 {dimension_numbers = #tpu.dot_dimension_numbers<[1], [0], [0], [1], [0, 0, 1, 1], [], []>} : vector<8x8xf32>, vector<8x8xf32>, vector<8x8xf32> -> vector<8x8xf32>
        %c0_63 = arith.constant 0 : index
        %c16 = arith.constant 16 : index
        %113 = vector.load %arg14[%c0_63, %c16] : memref<8x32xf32, #tpu.memory_space<vmem>>, vector<8x8xf32>
        %114 = vector.broadcast %101 : vector<8x1xf32> to vector<8x8xf32>
        %115 = arith.mulf %114, %113 : vector<8x8xf32>
        %116 = arith.addf %115, %112 : vector<8x8xf32>
        %c0_64 = arith.constant 0 : index
        %c16_65 = arith.constant 16 : index
        %117 = vector.load %arg14[%c0_64, %c16_65] : memref<8x32xf32, #tpu.memory_space<vmem>>, vector<8x8xf32>
        tpu.vector_store %arg14[%c0_64, %c16_65], %116 {strides = array<i32>} : memref<8x32xf32, #tpu.memory_space<vmem>>, vector<8x8xf32>,
        %c0_66 = arith.constant 0 : index
        %c2_67 = arith.constant 2 : index
        %118 = vector.load %arg12[%c0_66, %c2_67] : memref<8x4xf32, #tpu.memory_space<vmem>>, vector<8x1xf32>
        tpu.vector_store %arg12[%c0_66, %c2_67], %99 {strides = array<i32>} : memref<8x4xf32, #tpu.memory_space<vmem>>, vector<8x1xf32>,
        %119 = vector.extract_strided_slice %21 {offsets = [0, 24], sizes = [8, 8], strides = [1, 1]} : vector<8x32xf32> to vector<8x8xf32>
        %120 = vector.extract_strided_slice %16 {offsets = [0, 24], sizes = [8, 8], strides = [1, 1]} : vector<8x32xf32> to vector<8x8xf32>
        %cst_68 = arith.constant dense<0.000000e+00> : vector<8x8xf32>
        %121 = tpu.matmul %119, %120, %cst_68 {dimension_numbers = #tpu.dot_dimension_numbers<[1], [1], [0], [0], [0, 0, 1, 0], [], []>} : vector<8x8xf32>, vector<8x8xf32>, vector<8x8xf32> -> vector<8x8xf32>
        %cst_69 = arith.constant -1.000000e+30 : f32
        %122 = vector.broadcast %cst_69 : f32 to vector<8x8xf32>
        %123 = arith.select %34, %121, %122 : vector<8x8xi1>, vector<8x8xf32>
        %c0_70 = arith.constant 0 : index
        %c3 = arith.constant 3 : index
        %124 = vector.load %arg12[%c0_70, %c3] : memref<8x4xf32, #tpu.memory_space<vmem>>, vector<8x1xf32>
        %cst_71 = arith.constant dense<0xFF800000> : vector<8xf32>
        %125 = vector.multi_reduction <maximumf>, %123, %cst_71 [1] : vector<8x8xf32> to vector<8xf32>
        %126 = vector.shape_cast %125 : vector<8xf32> to vector<8x1xf32>
        %127 = arith.maximumf %124, %126 : vector<8x1xf32>
        %128 = arith.subf %124, %127 : vector<8x1xf32>
        %129 = math.exp %128 : vector<8x1xf32>
        %130 = vector.broadcast %127 : vector<8x1xf32> to vector<8x8xf32>
        %131 = arith.subf %123, %130 : vector<8x8xf32>
        %132 = math.exp %131 : vector<8x8xf32>
        %c0_72 = arith.constant 0 : index
        %c3_73 = arith.constant 3 : index
        %133 = vector.load %arg13[%c0_72, %c3_73] : memref<8x4xf32, #tpu.memory_space<vmem>>, vector<8x1xf32>
        %134 = arith.mulf %129, %133 : vector<8x1xf32>
        %cst_74 = arith.constant dense<0.000000e+00> : vector<8xf32>
        %135 = vector.multi_reduction <add>, %132, %cst_74 [1] : vector<8x8xf32> to vector<8xf32>
        %136 = vector.shape_cast %135 : vector<8xf32> to vector<8x1xf32>
        %137 = arith.addf %134, %136 : vector<8x1xf32>
        %c0_75 = arith.constant 0 : index
        %c3_76 = arith.constant 3 : index
        %138 = vector.load %arg13[%c0_75, %c3_76] : memref<8x4xf32, #tpu.memory_space<vmem>>, vector<8x1xf32>
        tpu.vector_store %arg13[%c0_75, %c3_76], %137 {strides = array<i32>} : memref<8x4xf32, #tpu.memory_space<vmem>>, vector<8x1xf32>,
        %139 = vector.extract_strided_slice %20 {offsets = [0, 24], sizes = [8, 8], strides = [1, 1]} : vector<8x32xf32> to vector<8x8xf32>
        %cst_77 = arith.constant dense<0.000000e+00> : vector<8x8xf32>
        %140 = tpu.matmul %132, %139, %cst_77 {dimension_numbers = #tpu.dot_dimension_numbers<[1], [0], [0], [1], [0, 0, 1, 1], [], []>} : vector<8x8xf32>, vector<8x8xf32>, vector<8x8xf32> -> vector<8x8xf32>
        %c0_78 = arith.constant 0 : index
        %c24 = arith.constant 24 : index
        %141 = vector.load %arg14[%c0_78, %c24] : memref<8x32xf32, #tpu.memory_space<vmem>>, vector<8x8xf32>
        %142 = vector.broadcast %129 : vector<8x1xf32> to vector<8x8xf32>
        %143 = arith.mulf %142, %141 : vector<8x8xf32>
        %144 = arith.addf %143, %140 : vector<8x8xf32>
        %c0_79 = arith.constant 0 : index
        %c24_80 = arith.constant 24 : index
        %145 = vector.load %arg14[%c0_79, %c24_80] : memref<8x32xf32, #tpu.memory_space<vmem>>, vector<8x8xf32>
        tpu.vector_store %arg14[%c0_79, %c24_80], %144 {strides = array<i32>} : memref<8x32xf32, #tpu.memory_space<vmem>>, vector<8x8xf32>,
        %c0_81 = arith.constant 0 : index
        %c3_82 = arith.constant 3 : index
        %146 = vector.load %arg12[%c0_81, %c3_82] : memref<8x4xf32, #tpu.memory_space<vmem>>, vector<8x1xf32>
        tpu.vector_store %arg12[%c0_81, %c3_82], %127 {strides = array<i32>} : memref<8x4xf32, #tpu.memory_space<vmem>>, vector<8x1xf32>,
      } else {
      }
    } else {
    }
    %c0_i32_4 = arith.constant 0 : i32
    %10 = arith.cmpi eq, %arg2, %c0_i32_4 : i32
    %11 = arith.extui %10 : i1 to i32
    %c0_i32_5 = arith.constant 0 : i32
    %12 = arith.cmpi ne, %11, %c0_i32_5 : i32
    scf.if %12 {
      %c0 = arith.constant 0 : index
      %c0_6 = arith.constant 0 : index
      %13 = vector.load %arg13[%c0, %c0_6] : memref<8x4xf32, #tpu.memory_space<vmem>>, vector<8x4xf32>
      %14 = tpu.reciprocal %13 : vector<8x4xf32> -> vector<8x4xf32>
      %c0_7 = arith.constant 0 : index
      %c0_8 = arith.constant 0 : index
      %15 = vector.load %arg14[%c0_7, %c0_8] : memref<8x32xf32, #tpu.memory_space<vmem>>, vector<8x8xf32>
      %16 = vector.extract_strided_slice %14 {offsets = [0, 0], sizes = [8, 1], strides = [1, 1]} : vector<8x4xf32> to vector<8x1xf32>
      %17 = vector.broadcast %16 : vector<8x1xf32> to vector<8x8xf32>
      %18 = arith.mulf %15, %17 : vector<8x8xf32>
      %c0_9 = arith.constant 0 : index
      %c0_10 = arith.constant 0 : index
      %19 = vector.load %arg14[%c0_9, %c0_10] : memref<8x32xf32, #tpu.memory_space<vmem>>, vector<8x8xf32>
      tpu.vector_store %arg14[%c0_9, %c0_10], %18 {strides = array<i32>} : memref<8x32xf32, #tpu.memory_space<vmem>>, vector<8x8xf32>,
      %c0_11 = arith.constant 0 : index
      %c8 = arith.constant 8 : index
      %20 = vector.load %arg14[%c0_11, %c8] : memref<8x32xf32, #tpu.memory_space<vmem>>, vector<8x8xf32>
      %21 = vector.extract_strided_slice %14 {offsets = [0, 1], sizes = [8, 1], strides = [1, 1]} : vector<8x4xf32> to vector<8x1xf32>
      %22 = vector.broadcast %21 : vector<8x1xf32> to vector<8x8xf32>
      %23 = arith.mulf %20, %22 : vector<8x8xf32>
      %c0_12 = arith.constant 0 : index
      %c8_13 = arith.constant 8 : index
      %24 = vector.load %arg14[%c0_12, %c8_13] : memref<8x32xf32, #tpu.memory_space<vmem>>, vector<8x8xf32>
      tpu.vector_store %arg14[%c0_12, %c8_13], %23 {strides = array<i32>} : memref<8x32xf32, #tpu.memory_space<vmem>>, vector<8x8xf32>,
      %c0_14 = arith.constant 0 : index
      %c16 = arith.constant 16 : index
      %25 = vector.load %arg14[%c0_14, %c16] : memref<8x32xf32, #tpu.memory_space<vmem>>, vector<8x8xf32>
      %26 = vector.extract_strided_slice %14 {offsets = [0, 2], sizes = [8, 1], strides = [1, 1]} : vector<8x4xf32> to vector<8x1xf32>
      %27 = vector.broadcast %26 : vector<8x1xf32> to vector<8x8xf32>
      %28 = arith.mulf %25, %27 : vector<8x8xf32>
      %c0_15 = arith.constant 0 : index
      %c16_16 = arith.constant 16 : index
      %29 = vector.load %arg14[%c0_15, %c16_16] : memref<8x32xf32, #tpu.memory_space<vmem>>, vector<8x8xf32>
      tpu.vector_store %arg14[%c0_15, %c16_16], %28 {strides = array<i32>} : memref<8x32xf32, #tpu.memory_space<vmem>>, vector<8x8xf32>,
      %c0_17 = arith.constant 0 : index
      %c24 = arith.constant 24 : index
      %30 = vector.load %arg14[%c0_17, %c24] : memref<8x32xf32, #tpu.memory_space<vmem>>, vector<8x8xf32>
      %31 = vector.extract_strided_slice %14 {offsets = [0, 3], sizes = [8, 1], strides = [1, 1]} : vector<8x4xf32> to vector<8x1xf32>
      %32 = vector.broadcast %31 : vector<8x1xf32> to vector<8x8xf32>
      %33 = arith.mulf %30, %32 : vector<8x8xf32>
      %c0_18 = arith.constant 0 : index
      %c24_19 = arith.constant 24 : index
      %34 = vector.load %arg14[%c0_18, %c24_19] : memref<8x32xf32, #tpu.memory_space<vmem>>, vector<8x8xf32>
      tpu.vector_store %arg14[%c0_18, %c24_19], %33 {strides = array<i32>} : memref<8x32xf32, #tpu.memory_space<vmem>>, vector<8x8xf32>,
      %c0_20 = arith.constant 0 : index
      %c0_21 = arith.constant 0 : index
      %35 = vector.load %arg14[%c0_20, %c0_21] : memref<8x32xf32, #tpu.memory_space<vmem>>, vector<8x32xf32>
      %c0_22 = arith.constant 0 : index
      %c0_23 = arith.constant 0 : index
      %36 = vector.load %arg8[%c0_22, %c0_23] : memref<32x32xf32, #tpu.memory_space<vmem>>, vector<32x32xf32>
      %cst_24 = arith.constant dense<0.000000e+00> : vector<8x32xf32>
      %37 = tpu.matmul %35, %36, %cst_24 {dimension_numbers = #tpu.dot_dimension_numbers<[1], [0], [0], [1], [0, 0, 1, 1], [], []>} : vector<8x32xf32>, vector<32x32xf32>, vector<8x32xf32> -> vector<8x32xf32>
      %c0_25 = arith.constant 0 : index
      %c0_26 = arith.constant 0 : index
      %38 = vector.load %arg9[%c0_25, %c0_26] : memref<1x32xf32, #tpu.memory_space<vmem>>, vector<1x32xf32>
      %39 = vector.broadcast %38 : vector<1x32xf32> to vector<8x32xf32>
      %40 = arith.addf %37, %39 : vector<8x32xf32>
      %c0_27 = arith.constant 0 : index
      %c0_28 = arith.constant 0 : index
      %c0_29 = arith.constant 0 : index
      %41 = vector.load %arg10[%c0_27, %c0_28, %c0_29] : memref<1x8x32xf32, #tpu.memory_space<vmem>>, vector<1x8x32xf32>
      %42 = vector.shape_cast %41 : vector<1x8x32xf32> to vector<8x32xf32>
      %43 = vector.shape_cast %40 : vector<8x32xf32> to vector<1x8x32xf32>
      tpu.vector_store %arg10[%c0_27, %c0_28, %c0_29], %43 {strides = array<i32>} : memref<1x8x32xf32, #tpu.memory_space<vmem>>, vector<1x8x32xf32>,
    } else {
    }
    return
  }
  func.func @transform_0(%arg0: i32, %arg1: i32, %arg2: i32) -> (i32, i32, i32) {
    %c0_i32 = arith.constant 0 : i32
    %c0_i32_0 = arith.constant 0 : i32
    return %arg0, %arg1, %c0_i32 : i32, i32, i32
  }
  func.func @transform_1(%arg0: i32, %arg1: i32, %arg2: i32) -> (i32, i32, i32) {
    %c0_i32 = arith.constant 0 : i32
    %c0_i32_0 = arith.constant 0 : i32
    return %arg0, %arg2, %c0_i32 : i32, i32, i32
  }
  func.func @transform_2(%arg0: i32, %arg1: i32, %arg2: i32) -> (i32, i32) {
    %c0_i32 = arith.constant 0 : i32
    %c0_i32_0 = arith.constant 0 : i32
    %c0_i32_1 = arith.constant 0 : i32
    return %c0_i32, %c0_i32_0 : i32, i32
  }
  func.func @transform_3(%arg0: i32, %arg1: i32, %arg2: i32) -> (i32, i32) {
    %c0_i32 = arith.constant 0 : i32
    %c0_i32_0 = arith.constant 0 : i32
    %c0_i32_1 = arith.constant 0 : i32
    return %c0_i32, %c0_i32_0 : i32, i32
  }
  func.func @transform_4(%arg0: i32, %arg1: i32, %arg2: i32) -> (i32, i32) {
    %c0_i32 = arith.constant 0 : i32
    %c0_i32_0 = arith.constant 0 : i32
    %c0_i32_1 = arith.constant 0 : i32
    return %c0_i32, %c0_i32_0 : i32, i32
  }
  func.func @transform_5(%arg0: i32, %arg1: i32, %arg2: i32) -> (i32, i32) {
    %c0_i32 = arith.constant 0 : i32
    %c0_i32_0 = arith.constant 0 : i32
    %c0_i32_1 = arith.constant 0 : i32
    return %c0_i32, %c0_i32_0 : i32, i32
  }
  func.func @transform_6(%arg0: i32, %arg1: i32, %arg2: i32) -> (i32, i32) {
    %c0_i32 = arith.constant 0 : i32
    %c0_i32_0 = arith.constant 0 : i32
    %c0_i32_1 = arith.constant 0 : i32
    return %c0_i32, %c0_i32_0 : i32, i32
  }
  func.func @transform_7(%arg0: i32, %arg1: i32, %arg2: i32) -> (i32, i32, i32) {
    %c0_i32 = arith.constant 0 : i32
    %c0_i32_0 = arith.constant 0 : i32
    return %arg0, %arg1, %c0_i32 : i32, i32, i32
  }
}

</mosaic_0001>

<bundles_post_ra>
// kernel: tpu_custom_call.1
= control target key start
LH: loop header
LB: loop body
LE: loop exit
PB: predicated region body
PF: predicated region fallthrough
CT: control target
= control target key end

     0   :  { %s2349_s0 = inlined_call_operand.hbm [shape: f32[2,8,32], index: 0, kind: input, shape index: {}]   ;;  %s2350_s1 = inlined_call_operand.hbm [shape: f32[2,8,32], index: 1, kind: input, shape index: {}]   ;;  %s2351_s2 = inlined_call_operand.hbm [shape: f32[32,32], index: 2, kind: input, shape index: {}]   ;;  %s2352_s3 = inlined_call_operand.hbm [shape: f32[32,32], index: 3, kind: input, shape index: {}]   ;;  %s2353_s4 = inlined_call_operand.hbm [shape: f32[32,32], index: 4, kind: input, shape index: {}]   ;;  %s2354_s5 = inlined_call_operand.hbm [shape: f32[32,32], index: 5, kind: input, shape index: {}]   ;;  %s2355_s6 = inlined_call_operand.vmem [shape: f32[1,32], index: 6, kind: input, shape index: {}]   ;;  %s2356_s7 = inlined_call_operand.hbm [shape: f32[2,8,32], index: 7, kind: output, shape index: {}]  }
   0x1   :  { %2360 = sst [smem:[#allocation28_spill]] %s2351_s2 }
   0x2   :  { %2361 = sst [smem:[#allocation29_spill]] %s2352_s3 }
   0x3   :  { %2362 = sst [smem:[#allocation30_spill]] %s2353_s4 }
   0x4   :  { %2363 = sst [smem:[#allocation31_spill]] %s2354_s5 }
   0x5   :  { %12 = vsyncpa [#allocation7], 0 }
   0x6   :  { %14 = vsyncpa [#allocation7 + $0x1], 0 }
   0x7   :  { %15 = vsyncpa [#allocation10], 0 }
   0x8   :  { %17 = vsyncpa [#allocation10 + $0x1], 0 }
   0x9   :  { %18 = vsyncpa [#allocation13], 0 }
   0xa   :  { %19 = vsyncpa [#allocation16], 0 }
   0xb   :  { %20 = vsyncpa [#allocation8], 0 }
   0xc   :  { %22 = vsyncpa [#allocation8 + $0x1], 0  ;;  %s2066_s24 = smov 0   ;;  %s2068_s25 = smov 0  }
   0xd   :  { %s2070_s26 = smov 0   ;;  %s2072_s27 = smov 0  }
   0xe   :  { %s2074_s28 = smov 0   ;;  %s2076_s29 = smov 0  }
   0xf LB: > { %2364 = sst [smem:[#allocation24_spill]] %s1994_s26  ;;  %s2097_s30 = sadd.s32 4294967295, %s2006_s29   ;;  %s2006_s29 = sphi %s2076_s29, %s28_s29   ;;  %s2002_s28 = sphi %s2074_s28, %s2381_s28   ;;  %s1998_s27 = sphi %s2072_s27, %s2380_s27   ;;  %s1994_s26 = sphi %s2070_s26, %s2379_s26   ;;  %s1990_s25 = sphi %s2068_s25, %s2383_s25   ;;  %s1986_s24 = sphi %s2066_s24, %s2382_s24  }
  0x10   : > { %2365 = sst [smem:[#allocation25_spill]] %s2002_s28  ;;  %p1527_p0 = scmp.ge.s32.totalorder %s2006_s29, 1 }
  0x11   : > { %p70_p1 = scmp.eq.s32.totalorder %s2097_s30, 0  ;;  %p241_p2 = scmp.lt.s32.totalorder %s2006_s29, 3 }
  0x12   : > { %s2366_s2 = sld [smem:[#allocation28_spill]]  ;;  %s2008_s12 = smov [#allocation11]  }
  0x13   : > { %p2105_p3 = pnand %p1527_p0, %p241_p2  ;;  %s254_s13 = sshll.u32 %s2008_s12, 4  ;;  %s255_s13 = int_to_ptr.vmem [resolvable:$true] %s254_s13 }
  0x14   : > { %p1532_p6 = scmp.ge.s32.totalorder %s2006_s29, 2  ;;  %s2369_s3 = sld [smem:[#allocation29_spill]] }
  0x15   : > { %p1599_p4 = pneg %p2105_p3  ;;  %s2009_s18 = smov 128  }
  0x16   : > { %s2010_s19 = smov 8   ;;  %s2011_s20 = smov [#allocation12]  }
  0x17   : > { %p2113_p5 = pnand %p1599_p4, %p70_p1  ;;  %s268_s21 = sshll.u32 %s2011_s20, 4  ;;  %s269_s21 = int_to_ptr.vmem [resolvable:$true] %s268_s21 }
  0x18   : > { %s252_s10 = sshll.u32 %s2366_s2, 4  ;;  %s2370_s4 = sld [smem:[#allocation30_spill]]  ;;  %s253_s10 = int_to_ptr.hbm [resolvable:$true] %s252_s10 }
  0x19   : > { %1602 = dma.hbm_to_vmem [thread:$0]  (!%p2113_p5), %s253_s10, 512, %s255_s13, [#allocation10], %s2009_s18, %s2009_s18, %s2010_s19  }
  0x1a   : > { %s266_s17 = sshll.u32 %s2369_s3, 4  ;;  %s2371_s5 = sld [smem:[#allocation31_spill]]  ;;  %s267_s17 = int_to_ptr.hbm [resolvable:$true] %s266_s17 }
  0x1b   : > { %1605 = dma.hbm_to_vmem [thread:$0]  (!%p2113_p5), %s267_s17, 512, %s269_s21, [#allocation13], %s2009_s18, %s2009_s18, %s2010_s19  }
  0x1c   : > { %s2012_s13 = smov [#allocation14]   ;;  %s2013_s16 = smov [#allocation15]  }
  0x1d   : > { %s282_s15 = sshll.u32 %s2012_s13, 4  ;;  %s296_s20 = sshll.u32 %s2013_s16, 4  ;;  %s283_s15 = int_to_ptr.vmem [resolvable:$true] %s282_s15  ;;  %s297_s20 = int_to_ptr.vmem [resolvable:$true] %s296_s20 }
  0x1e   : > { %s280_s8 = sshll.u32 %s2370_s4, 4  ;;  %s1526_s17 = sadd.s32 4294967294, %s2006_s29   ;;  %s281_s8 = int_to_ptr.hbm [resolvable:$true] %s280_s8 }
  0x1f   : > { %1608 = dma.hbm_to_vmem [thread:$0]  (!%p2113_p5), %s281_s8, 512, %s283_s15, [#allocation13], %s2009_s18, %s2009_s18, %s2010_s19  }
  0x20   : > { %s294_s10 = sshll.u32 %s2371_s5, 4  ;;  %s47_s21 = sadd.s32 1, %s2002_s28  ;;  %s295_s10 = int_to_ptr.hbm [resolvable:$true] %s294_s10 }
  0x21   : > { %1611 = dma.hbm_to_vmem [thread:$0]  (!%p2113_p5), %s295_s10, 512, %s297_s20, [#allocation16], %s2009_s18, %s2009_s18, %s2010_s19  }
  0x22   : > { %p49_p7 = scmp.ge.s32.totalorder %s47_s21, 2  ;;  %s56_s22 = sadd.s32 1, %s1994_s26 }
  0x23   : > { %p63_p8 = scmp.ne.s32.totalorder %s1994_s26, %s1990_s25  ;;  %p64_p9 = scmp.eq.s32.totalorder %s2006_s29, 0 }
  0x24   : > { %s2385_s21 = smov (%p49_p7, %s47_s21), 0  ;;  %p69_p11 = scmp.ne.s32.totalorder %s1990_s25, %s1986_s24 }
  0x25   : > { %2372 = sst [smem:[#allocation26_spill]] %s2385_s21  ;;  %p2143_p10 = por %p64_p9, %p63_p8 }
  0x26   : > { %s51_s14 = ssub.s32 %s2002_s28, %s2385_s21  ;;  %p228_p12 = scmp.eq.s32.totalorder %s2097_s30, 1 }
  0x27   : > { %p54_p13 = scmp.eq.s32.totalorder %s51_s14, 0  ;;  %p2154_p0 = por %p70_p1, %p69_p11 }
  0x28   : > { %p2158_p2 = por %p228_p12, %p63_p8  ;;  %p234_p4 = scmp.eq.s32.totalorder %s1526_s17, 1 }
  0x29   : > { %s2163_s8 = scalar_select %p54_p13, %s1994_s26, %s56_s22  }
  0x2a   : > { %p2165_p5 = por %p234_p4, %p69_p11  ;;  %p1627_p7 = scmp.lt.s32.totalorder %s2006_s29, 2 }
  0x2b   : > { %2376 = sst [smem:[#allocation27_spill]] %s2163_s8  ;;  %s313_s12 = sand.u32 1, %s1994_s26  }
  0x2c   : > { %s1534_s10 = sshll.u32 %s2002_s28, 3  ;;  %s1533_s13 = sshll.u32 %s313_s12, 3 }
  0x2d   : > { %s322_s20 = scalar_lea.hbm %s2349_s0, %s1534_s10  ;;  %s317_s2 = scalar_lea.vmem [#allocation6], %s1533_s13 }
  0x2e   : > { %s324_s14 = sshll.u32 %s322_s20, 4  ;;  %s326_s3 = sshll.u32 %s317_s2, 4  ;;  %s325_s14 = int_to_ptr.hbm [resolvable:$true] %s324_s14  ;;  %s327_s3 = int_to_ptr.vmem [resolvable:$true] %s326_s3 }
  0x2f   : > { %p1613_p8 = pnand %p1627_p7, %p2143_p10  ;;  %s342_s4 = scalar_lea.hbm %s2350_s1, %s1534_s10 }
  0x30   : > { %s333_s5 = sand.u32 1, %s2006_s29   ;;  %s314_s21 = scalar_lea.sflag [#allocation7], %s313_s12 }
  0x31   : > { %1615 = dma.hbm_to_vmem [thread:$0]  (!%p1613_p8), %s325_s14, 128, %s327_s3, %s314_s21  }
  0x32   : > { %s344_s28 = sshll.u32 %s342_s4, 4  ;;  %s337_s8 = scalar_lea.vmem [#allocation9], %s1533_s13  ;;  %s345_s28 = int_to_ptr.hbm [resolvable:$true] %s344_s28 }
  0x33   : > { %s346_s26 = sshll.u32 %s337_s8, 4  ;;  %s334_s15 = scalar_lea.sflag [#allocation10], %s333_s5  ;;  %s347_s26 = int_to_ptr.vmem [resolvable:$true] %s346_s26 }
  0x34   : > { %1618 = dma.hbm_to_vmem [thread:$0]  (!%p1613_p8), %s345_s28, 128, %s347_s26, %s334_s15  }
  0x35   : > { %355 = sbr.rel (%p2105_p3) target bundleno = 1161 (0x489), region = 48  ;;  %s2184_s2 = sand.u32 (!%p2105_p3), 1, %s1990_s25  }
  0x36   : > { %s2187_s23 = sshll.u32 (!%p2105_p3), %s2184_s2, 3  ;;  %s358_s3 = scalar_lea.sflag (!%p2105_p3), [#allocation7], %s2184_s2 }
  0x37   : > { %s361_s4 = scalar_lea.vmem (!%p2105_p3), [#allocation6], %s2187_s23 }
  0x3a   : > { %1961 = dma.done.wait (%p2154_p0), %s358_s3, 128  }
  0x3b   : > { %1963 = vsyncadd (%p2154_p0), %s358_s3, 4294967168  ;;  %s367_s5 = sand.u32 1, %s2097_s30   ;;  %s371_s28 = scalar_lea.vmem [#allocation9], %s2187_s23 }
  0x3c   : > { %s368_s26 = scalar_lea.sflag [#allocation10], %s367_s5 }
  0x3d   : > { %1965 = dma.done.wait (%p2154_p0), %s368_s26, 128  }
  0x3e   : > { %1967 = vsyncadd (%p2154_p0), %s368_s26, 4294967168 }
  0x3f   : > { %1969 = dma.done.wait (%p70_p1), [#allocation10], 512  }
  0x40   : > { %1971 = vsyncadd (%p70_p1), [#allocation10], 4294966784 }
  0x41   : > { %1973 = dma.done.wait (%p70_p1), [#allocation13], 1024  }
  0x42   : > { %1975 = vsyncadd (%p70_p1), [#allocation13], 4294966272 }
  0x43   : > { %1977 = dma.done.wait (%p70_p1), [#allocation16], 512  }
  0x44   : > { %1979 = vsyncadd (%p70_p1), [#allocation16], 4294966784  ;;  %v440_v0 = vld [vmem:[#allocation11 + $0x18] sm:$0xff]  ;;  %v439_v2 = vld [vmem:[#allocation11 + $0x10] sm:$0xff]  ;;  %vm441_vm0 = vcmask 261120   ;;  %vm910_vm1 = vcmask 64512   ;;  %v901_v23 = vlaneseq }
  0x45   : > { %v479_v1 = vld [vmem:[#allocation12 + $0x18] sm:$0xff]  ;;  %457 = vmatpush.msra.mxu0 %v440_v0  ;;  %v478_v3 = vld [vmem:[#allocation12 + $0x10] sm:$0xff]  ;;  %v438_v4 = vld [vmem:[#allocation11 + $0x8] sm:$0xff]  ;;  %s2014_s30 = smov 120   ;;  %s2015_s11 = smov 104   ;;  %vm467_vm3 = vcmask 31744  }
  0x46   : > { %496 = vmatpush.msra.mxu1 %v479_v1  ;;  %v477_v5 = vld [vmem:[#allocation12 + $0x8] sm:$0xff]  ;;  %v437_v6 = vld [vmem:[#allocation11] sm:$0xff]  ;;  %v475_v9 = vld [vmem:[%s371_s28] sm:$0xff]  ;;  %s2016_s21 = smov 112   ;;  %v902_v25 = vshrl.u32 %v901_v23, 7  ;;  %v906_v26 = vand.u32 127, %v901_v23 }
  0x47   : > { %458 = vmatpush.msra.mxu0 %v439_v2  ;;  %v476_v7 = vld [vmem:[#allocation12] sm:$0xff]  ;;  %v507_v14 = vld [vmem:[#allocation14 + $0x18] sm:$0xff]  ;;  %v506_v15 = vld [vmem:[#allocation14 + $0x10] sm:$0xff]  ;;  %v2017_v31 = vmov -inf   ;;  %v2018_v32 = vmov 0   ;;  %v2019_v33 = vmov 0.0  }
  0x48   : > { %497 = vmatpush.msra.mxu1 %v478_v3  ;;  %v436_v8 = vld [vmem:[%s361_s4] sm:$0xff]  ;;  %520 = vmatpush.msra.mxu2 %v507_v14  ;;  %vm909_vm2 = vcmp.le.s32.totalorder %v906_v26, %v902_v25  ;;  %468 = vst.msk [vmem:[#allocation3] sm:$0xff] %vm467_vm3, %v2017_v31  ;;  %vm960_vm4 = vcmask 7168   ;;  %v2020_v47 = vmov 1   ;;  %v2021_v48 = vmov 2   ;;  %s2023_s18 = smov 8  }
  0x49   : > { %459 = vmatpush.msra.mxu0 %v438_v4  ;;  %v505_v16 = vld [vmem:[#allocation14 + $0x8] sm:$0xff]  ;;  %v504_v17 = vld [vmem:[#allocation14] sm:$0xff]  ;;  %1699 = vset.pattern.permute.xlu0 %v2018_v32  ;;  %469 = vst.msk [vmem:[#allocation4] sm:$0xff] %vm467_vm3, %v2019_v33  ;;  %vm1046_vm5 = vcmask 15368   ;;  %vm1141_vm6 = vcmask 23568   ;;  %v2022_v59 = vmov 3  }
  0x4a   : > { %498 = vmatpush.msra.mxu1 %v477_v5  ;;  %521 = vmatpush.msra.mxu2 %v506_v15  ;;  %470 = vst.msk [vmem:[#allocation5] sm:$0xff] %vm441_vm0, %v2019_v33  ;;  %vm1235_vm7 = vcmask 31768   ;;  %s2024_s8 = smov 16   ;;  %s2025_s12 = smov 24   ;;  %vm1087_vm12 = vcmask 130112   ;;  %vm1181_vm13 = vcmask 195712  }
  0x4b   : > { %460 = vmatpush.msra.mxu0 %v437_v6  ;;  %1700 = vset.pattern.permute.xlu1 %v2020_v47  ;;  %vm1275_vm14 = vcmask 261312   ;;  %s1574_s10 = sshll.u32 %s1998_s27, 3  ;;  %s427_s22 = scalar_lea.vmem [#allocation17], %s2187_s23 }
  0x4c   : > { %499 = vmatpush.msra.mxu1 %v476_v7  ;;  %1545 = vmatmul.msk.f32.vlgmr.msra.gmra.mxu0 %vm441_vm0, %v436_v8  ;;  %s1375_s20 = scalar_lea.hbm %s2356_s7, %s1574_s10  ;;  %s1377_s15 = sshll.u32 %s427_s22, 4  ;;  %s1378_s15 = int_to_ptr.vmem [resolvable:$true] %s1377_s15 }
  0x4d   : > { %1546 = vmatmul.msk.f32.vlgmr.msra.gmra.mxu1 %vm441_vm0, %v475_v9  ;;  %522 = vmatpush.msra.mxu2 %v505_v16  ;;  %s1379_s3 = sshll.u32 %s1375_s20, 4  ;;  %s1364_s4 = scalar_lea.sflag [#allocation8], %s2184_s2  ;;  %s1380_s3 = int_to_ptr.hbm [resolvable:$true] %s1379_s3 }
  0x4e   : > { %1701 = vset.pattern.permute.xlu2 %v2021_v48  ;;  %s1922_s27 = sshra.s32 %s1380_s3, 4  ;;  %s1928_s23 = scalar_lea.hbm %s2356_s7, 16  ;;  %s1923_s27 = int_to_ptr.hbm [resolvable:$true] %s1922_s27 }
  0x4f   : > { %523 = vmatpush.msra.mxu2 %v504_v17  ;;  %v2244_v40 = vld [vmem:[#allocation3] sm:$0xff]  ;;  %s1924_s5 = scalar_lea.hbm %s1923_s27, 8  ;;  %p1929_p10 = scmp.lt.s32.totalorder %s1923_s27, %s2356_s7 }
  0x50   : > { %1547 = vmatmul.msk.f32.vlgmr.msra.gmra.mxu2 %vm441_vm0, %v475_v9  ;;  %p1925_p1 = scmp.ne.s32.totalorder %s1923_s27, %s1924_s5  ;;  %p1930_p11 = scmp.lt.s32.totalorder %s1928_s23, %s1924_s5 }
  0x52   : > { %p1926_p3 = pnand %p1925_p1, %p2158_p2  ;;  %p1931_p12 = por %p1930_p11, %p1929_p10 }
  0x54   : > { %p1927_p9 = pneg %p1926_p3 }
  0x56   : > { %p1932_p13 = pnand %p1931_p12, %p1927_p9 }
  0xc9   : > { %v462_v10 = vpop.f32.mrf.mxu0 }
  0xca   : > { %v501_v11 = vpop.f32.mrf.mxu1  ;;  %v465_v12 = vmul.f32 0.17677669, %v462_v10 }
  0xcb   : > { %997 = vrot.lane.b32.xlu0 %v501_v11, %s2014_s30  ;;  %1186 = vrot.lane.b32.xlu2 %v501_v11, %s2015_s11 }
  0xcc   : > { %1092 = vrot.lane.b32.xlu1 %v501_v11, %s2016_s21  ;;  %1560 = vmatpush.xpose.msk.msra.mxu3 %vm910_vm1, %v501_v11  ;;  %466 = vst.msk [vmem:[#allocation2] sm:$0xff] %vm441_vm0, %v465_v12 }
  0xd3   : > { %v528_v13 = vld [vmem:[#allocation2] sm:$0xff]  ;;  %v2233_v30 = vpop.f32.mrf.mxu2 }
  0xd4   : > { %1184 = vrot.lane.b32.xlu2 %v528_v13, %s2015_s11  ;;  %1090 = vrot.lane.b32.xlu1 %v528_v13, %s2016_s21 }
  0xd5   : > { %995 = vrot.lane.b32.xlu0 %v528_v13, %s2014_s30  ;;  %1561 = vmatmul.msk.f32.vlgmr.msra.gmra.mxu3 %vm910_vm1, %v528_v13 }
  0xd6   : > { %980 = vmatpush.msrb.mxu3 %v2233_v30 }
 0x125   : > { %v1187_v19 = vpop.permute.xlu2 %1186 }
 0x12e   : > { %v1185_v24 = vpop.permute.xlu2 %1184 }
 0x13d   : > { %v998_v18 = vpop.permute.xlu0 %997 }
 0x13e   : > { %1563 = vmatpush.xpose.msk.msrb.mxu0 %vm910_vm1, %v998_v18  ;;  %v1093_v20 = vpop.permute.xlu1 %1092 }
 0x13f   : > { %1566 = vmatpush.xpose.msk.msrb.mxu2 %vm910_vm1, %v1093_v20 }
 0x142   : > { %1569 = vmatpush.xpose.msk.msra.mxu0 %vm910_vm1, %v1187_v19  ;;  %v954_v19 = vld [vmem:[#allocation4] sm:$0xff] }
 0x146   : > { %v1091_v21 = vpop.permute.xlu1 %1090 }
 0x147   : > { %v996_v22 = vpop.permute.xlu0 %995  ;;  %1567 = vmatmul.msk.f32.vlgmr.msrb.gmra.mxu2 %vm910_vm1, %v1091_v21 }
 0x148   : > { %1564 = vmatmul.msk.f32.vlgmr.msrb.gmra.mxu0 %vm910_vm1, %v996_v22 }
 0x150   : > { %1570 = vmatmul.msk.f32.vlgmr.msra.gmra.mxu0 %vm910_vm1, %v1185_v24 }
 0x158   : > { %v934_v27 = vpop.f32.mrf.mxu3 }
 0x159   : > { %v937_v28 = vsel %vm909_vm2, %v934_v27, -1e+30 }
 0x15a   : > { %v939_v29 = vsel %vm910_vm1, %v937_v28, -inf }
 0x15b   : > { %940 = vmax.xlane.f32.xlu0 %v939_v29 }
 0x1c5   : > { %v1020_v34 = vpop.f32.mrf.mxu0 }
 0x1c6   : > { %v2238_v35 = vsel %vm909_vm2, %v1020_v34, -1e+30 }
 0x1c7   : > { %v1025_v36 = vsel %vm910_vm1, %v2238_v35, -inf }
 0x1c8   : > { %1026 = vmax.xlane.f32.xlu1 %v1025_v36 }
 0x1ca   : > { %v1115_v37 = vpop.f32.mrf.mxu2 }
 0x1cb   : > { %v1118_v38 = vsel %vm909_vm2, %v1115_v37, -1e+30 }
 0x1cc   : > { %v1120_v39 = vsel %vm910_vm1, %v1118_v38, -inf }
 0x1cd   : > { %1121 = vmax.xlane.f32.xlu2 %v1120_v39  ;;  %v1209_v41 = vpop.f32.mrf.mxu0 }
 0x1ce   : > { %v941_v42 = vpop.xlane.xlu0 %940  ;;  %v2248_v44 = vsel %vm909_vm2, %v1209_v41, -1e+30 }
 0x1cf   : > { %v942_v43 = vmax.f32 %v2244_v40, %v941_v42  ;;  %v1214_v46 = vsel %vm910_vm1, %v2248_v44, -inf }
 0x1d1   : > { %v943_v45 = vsub.f32 %v2244_v40, %v942_v43  ;;  %994 = vst.msk [vmem:[#allocation3] sm:$0xff] %vm960_vm4, %v942_v43  ;;  %948 = vperm.xlu0 %1699, %v942_v43  }
 0x1d3   : > { %v944_v12 = vmul.f32 1.442695, %v943_v45  ;;  %v985_v45 = vld [vmem:[#allocation5] sm:$0xff] }
 0x1d5   : > { %1215 = vmax.xlane.f32.xlu2 %v1214_v46 }
 0x1d8   : > { %v1024_v50 = vld [vmem:[#allocation3] sm:$0xff] }
 0x23b   : > { %v1027_v49 = vpop.xlane.xlu1 %1026 }
 0x23c   : > { %v1028_v51 = vmax.f32 %v1024_v50, %v1027_v49 }
 0x23e   : > { %v1029_v52 = vsub.f32 %v1024_v50, %v1028_v51  ;;  %1089 = vst.msk [vmem:[#allocation3] sm:$0xff] %vm1046_vm5, %v1028_v51  ;;  %1034 = vperm.xlu1 %1700, %v1028_v51  }
 0x240   : > { %v1122_v55 = vpop.xlane.xlu2 %1121  ;;  %v1030_v16 = vmul.f32 1.442695, %v1029_v52 }
 0x243   : > { %v949_v53 = vpop.permute.xlu0 %948 }
 0x244   : > { %v951_v54 = vsub.f32 %v937_v28, %v949_v53 }
 0x245   : > { %v2257_v56 = vld [vmem:[#allocation3] sm:$0xff] }
 0x246   : > { %v2260_v57 = vmax.f32 %v2257_v56, %v1122_v55  ;;  %v952_v58 = vmul.f32 1.442695, %v951_v54  ;;  %1049 = vrot.lane.b32.xlu1 %v2233_v30, %s2014_s30 }
 0x247   : > { %1702 = vset.pattern.permute.xlu1 %v2022_v59 }
 0x248   : > { %v1124_v60 = vsub.f32 %v2257_v56, %v2260_v57  ;;  %1183 = vst.msk [vmem:[#allocation3] sm:$0xff] %vm1141_vm6, %v2260_v57  ;;  %1710 = vpow2.f32 %v952_v58  ;;  %1129 = vperm.xlu2 %1701, %v2260_v57   ;;  %v1216_v62 = vpop.xlane.xlu2 %1215 }
 0x24a   : > { %v1125_v31 = vmul.f32 1.442695, %v1124_v60 }
 0x24e   : > { %v1711_v61 = vpop.eup %1710 }
 0x24f   : > { %v1213_v63 = vld [vmem:[#allocation3] sm:$0xff]  ;;  %1562 = vmatmul.msk.f32.vlgmr.msrb.gmra.mxu3 %vm910_vm1, %v1711_v61  ;;  %v956_v0 = vsel %vm910_vm1, %v1711_v61, 0.0 }
 0x250   : > { %v1217_v1 = vmax.f32 %v1213_v63, %v1216_v62  ;;  %957 = vadd.xlane.f32.xlu0 %v956_v0  ;;  %1143 = vrot.lane.b32.xlu2 %v2233_v30, %s2016_s21 }
 0x251   : > { %1704 = vset.pattern.permute.xlu2 %v2020_v47 }
 0x252   : > { %v1218_v2 = vsub.f32 %v1213_v63, %v1217_v1  ;;  %1277 = vst.msk [vmem:[#allocation3] sm:$0xff] %vm1235_vm7, %v1217_v1  ;;  %1223 = vperm.xlu1 %1702, %v1217_v1  }
 0x254   : > { %v1219_v22 = vmul.f32 1.442695, %v1218_v2 }
 0x258   : > { %1237 = vrot.lane.b32.xlu2 %v2233_v30, %s2015_s11 }
 0x25a   : > { %1703 = vset.pattern.permute.xlu1 %v2018_v32 }
 0x2a2   : > { %v1130_v3 = vpop.permute.xlu2 %1129 }
 0x2a3   : > { %v1132_v4 = vsub.f32 %v1118_v38, %v1130_v3 }
 0x2a5   : > { %v1133_v5 = vmul.f32 1.442695, %v1132_v4 }
 0x2a7   : > { %1712 = vpow2.f32 %v1133_v5 }
 0x2aa   : > { %v1144_v6 = vpop.permute.xlu2 %1143 }
 0x2ab   : > { %1164 = vmatpush.msra.mxu3 %v1144_v6 }
 0x2ad   : > { %v1713_v7 = vpop.eup %1712 }
 0x2ae   : > { %1568 = vmatmul.msk.f32.vlgmr.msra.gmra.mxu3 %vm910_vm1, %v1713_v7  ;;  %v1137_v8 = vsel %vm910_vm1, %v1713_v7, 0.0 }
 0x2af   : > { %1138 = vadd.xlane.f32.xlu2 %v1137_v8 }
 0x2b0   : > { %v1035_v9 = vpop.permute.xlu1 %1034 }
 0x2b1   : > { %v1037_v10 = vsub.f32 %v2238_v35, %v1035_v9 }
 0x2b2   : > { %v1238_v14 = vpop.permute.xlu2 %1237 }
 0x2b3   : > { %v1038_v11 = vmul.f32 1.442695, %v1037_v10 }
 0x2b5   : > { %1714 = vpow2.f32 %v1038_v11 }
 0x2b6   : > { %1716 = vpow2.f32 %v944_v12 }
 0x2b7   : > { %1718 = vpow2.f32 %v1030_v16 }
 0x2b8   : > { %v1050_v13 = vpop.permute.xlu1 %1049  ;;  %1720 = vpow2.f32 %v1219_v22 }
 0x2b9   : > { %1070 = vmatpush.msrb.mxu1 %v1050_v13 }
 0x2bb   : > { %1258 = vmatpush.msra.mxu1 %v1238_v14  ;;  %v1715_v15 = vpop.eup %1714 }
 0x2bc   : > { %1565 = vmatmul.msk.f32.vlgmr.msrb.gmra.mxu1 %vm910_vm1, %v1715_v15  ;;  %v1042_v17 = vsel %vm910_vm1, %v1715_v15, 0.0  ;;  %v1717_v18 = vpop.eup %1716 }
 0x2bd   : > { %1043 = vadd.xlane.f32.xlu1 %v1042_v17  ;;  %v955_v20 = vmul.f32 %v1717_v18, %v954_v19  ;;  %v1719_v26 = vpop.eup %1718  ;;  %v1332_v19 = vld [vmem:[#allocation15 + $0x10] sm:$0xff] }
 0x2be   : > { %v1721_v28 = vpop.eup %1720 }
 0x2c3   : > { %v958_v21 = vpop.xlane.xlu0 %957 }
 0x2c4   : > { %v959_v23 = vadd.f32 %v958_v21, %v955_v20  ;;  %v1224_v24 = vpop.permute.xlu1 %1223  ;;  %v1331_v20 = vld [vmem:[#allocation15 + $0x8] sm:$0xff]  ;;  %v1330_v21 = vld [vmem:[#allocation15] sm:$0xff] }
 0x2c5   : > { %v1226_v25 = vsub.f32 %v2248_v44, %v1224_v24 }
 0x2c6   : > { %961 = vst.msk [vmem:[#allocation4] sm:$0xff] %vm960_vm4, %v959_v23 }
 0x2c7   : > { %v1227_v27 = vmul.f32 1.442695, %v1226_v25  ;;  %1078 = vperm.xlu2 %1704, %v1719_v26  }
 0x2c9   : > { %1722 = vpow2.f32 %v1227_v27 }
 0x2ca   : > { %1724 = vpow2.f32 %v1125_v31 }
 0x2cd   : > { %v1040_v33 = vld [vmem:[#allocation4] sm:$0xff] }
 0x2ce   : > { %v1041_v34 = vmul.f32 %v1719_v26, %v1040_v33 }
 0x2cf   : > { %v1723_v29 = vpop.eup %1722  ;;  %1706 = vset.pattern.permute.xlu2 %v2022_v59 }
 0x2d0   : > { %1571 = vmatmul.msk.f32.vlgmr.msra.gmra.mxu1 %vm910_vm1, %v1723_v29  ;;  %1266 = vperm.xlu2 %1706, %v1721_v28   ;;  %v1231_v30 = vsel %vm910_vm1, %v1723_v29, 0.0  ;;  %v1725_v32 = vpop.eup %1724 }
 0x2d1   : > { %1232 = vadd.xlane.f32.xlu0 %v1231_v30 }
 0x2d2   : > { %v982_v37 = vpop.f32.mrf.mxu3 }
 0x2d6   : > { %988 = vperm.xlu1 %1703, %v1717_v18   ;;  %v1333_v18 = vld [vmem:[#allocation15 + $0x18] sm:$0xff] }
 0x2d7   : > { %1354 = vmatpush.msra.mxu2 %v1333_v18 }
 0x2d8   : > { %1707 = vset.pattern.permute.xlu2 %v2020_v47 }
 0x2d9   : > { %1355 = vmatpush.msra.mxu2 %v1332_v19 }
 0x2db   : > { %1356 = vmatpush.msra.mxu2 %v1331_v20 }
 0x2dd   : > { %1357 = vmatpush.msra.mxu2 %v1330_v21 }
 0x2de   : > { %1705 = vset.pattern.permute.xlu1 %v2021_v48 }
 0x2df   : > { %1172 = vperm.xlu1 %1705, %v1725_v32  }
 0x322   : > { %v1139_v41 = vpop.xlane.xlu2 %1138 }
 0x32a   : > { %v1079_v2 = vpop.permute.xlu2 %1078 }
 0x330   : > { %v1044_v35 = vpop.xlane.xlu1 %1043 }
 0x331   : > { %v1045_v36 = vadd.f32 %v1044_v35, %v1041_v34  ;;  %v1166_v43 = vpop.f32.mrf.mxu3 }
 0x332   : > { %v1267_v11 = vpop.permute.xlu2 %1266 }
 0x333   : > { %1047 = vst.msk [vmem:[#allocation4] sm:$0xff] %vm1046_vm5, %v1045_v36 }
 0x339   : > { %v1072_v38 = vpop.f32.mrf.mxu1 }
 0x33a   : > { %1083 = vrot.lane.b32.xlu0 %v1072_v38, %s2023_s18  ;;  %v1135_v39 = vld [vmem:[#allocation4] sm:$0xff] }
 0x33b   : > { %v1136_v40 = vmul.f32 %v1725_v32, %v1135_v39  ;;  %v1709_v32 = vld [vmem:[%s2355_s6] ss:$0 sm:$0xff] }
 0x33d   : > { %v1140_v42 = vadd.f32 %v1139_v41, %v1136_v40 }
 0x33f   : > { %1142 = vst.msk [vmem:[#allocation4] sm:$0xff] %vm1141_vm6, %v1140_v42 }
 0x342   : > { %1177 = vrot.lane.b32.xlu0 %v1166_v43, %s2024_s8 }
 0x344   : > { %v1233_v47 = vpop.xlane.xlu0 %1232 }
 0x346   : > { %v1229_v44 = vld [vmem:[#allocation4] sm:$0xff] }
 0x347   : > { %v1230_v46 = vmul.f32 %v1721_v28, %v1229_v44 }
 0x348   : > { %v989_v48 = vpop.permute.xlu1 %988 }
 0x349   : > { %v1234_v49 = vadd.f32 %v1233_v47, %v1230_v46  ;;  %v991_v50 = vmul.f32 %v989_v48, %v985_v45 }
 0x34b   : > { %1236 = vst.msk [vmem:[#allocation4] sm:$0xff] %vm1235_vm7, %v1234_v49  ;;  %v992_v51 = vadd.f32 %v991_v50, %v982_v37 }
 0x34d   : > { %993 = vst.msk [vmem:[#allocation5] sm:$0xff] %vm910_vm1, %v992_v51  ;;  %v1260_v52 = vpop.f32.mrf.mxu1 }
 0x34e   : > { %1271 = vrot.lane.b32.xlu1 %v1260_v52, %s2025_s12 }
 0x351   : > { %v1173_v6 = vpop.permute.xlu1 %1172 }
 0x352   : > { %v1281_v53 = vld [vmem:[#allocation4] sm:$0xff] }
 0x353   : > { %1726 = vrcp.f32 %v1281_v53  ;;  %v1293_v57 = vand.u32 2147483648, %v1281_v53  ;;  %v1291_v60 = vand.u32 2147483647, %v1281_v53  ;;  %vm1287_vm9 = vweird.f32 %v1281_v53 }
 0x354   : > { %v1075_v1 = vld [vmem:[#allocation5] sm:$0xff] }
 0x355   : > { %v1294_v62 = vor.u32 1.1754944e-38, %v1293_v57  ;;  %vm1292_vm11 = vcmp.eq.f32.partialorder %v1291_v60, 8.507059e+37  ;;  %v1081_v3 = vmul.f32 %v1079_v2, %v1075_v1 }
 0x359   : > { %v1727_v54 = vpop.eup %1726 }
 0x35a   : > { %v1283_v55 = vmul.f32 %v1727_v54, %v1281_v53  ;;  %vm1288_vm8 = vweird.f32 %v1727_v54 }
 0x35b   : > { %vm1289_vm10 = vmor %vm1287_vm9, %vm1288_vm8 }
 0x35c   : > { %v1284_v56 = vsub.f32 1.0, %v1283_v55 }
 0x35e   : > { %v1285_v58 = vmul.f32 %v1727_v54, %v1284_v56 }
 0x360   : > { %v1286_v61 = vadd.f32 %v1727_v54, %v1285_v58 }
 0x362   : > { %v1290_v63 = vsel %vm1289_vm10, %v1727_v54, %v1286_v61 }
 0x363   : > { %v1295_v0 = vsel %vm1292_vm11, %v1294_v62, %v1290_v63 }
 0x364   : > { %1315 = vperm.xlu1 %1705, %v1295_v0   ;;  %1307 = vperm.xlu2 %1707, %v1295_v0  }
 0x365   : > { %1299 = vperm.xlu0 %1699, %v1295_v0  }
 0x36d   : > { %1708 = vset.pattern.permute.xlu0 %v2022_v59 }
 0x36e   : > { %1323 = vperm.xlu0 %1708, %v1295_v0  }
 0x3ac   : > { %v1084_v4 = vpop.permute.xlu0 %1083 }
 0x3ad   : > { %v1086_v5 = vadd.f32 %v1084_v4, %v1081_v3 }
 0x3af   : > { %1088 = vst.msk [vmem:[#allocation5] sm:$0xff] %vm1087_vm12, %v1086_v5 }
 0x3b4   : > { %v1178_v9 = vpop.permute.xlu0 %1177 }
 0x3b6   : > { %v1169_v7 = vld [vmem:[#allocation5] sm:$0xff] }
 0x3b7   : > { %v1175_v8 = vmul.f32 %v1173_v6, %v1169_v7 }
 0x3b9   : > { %v1180_v10 = vadd.f32 %v1178_v9, %v1175_v8 }
 0x3bb   : > { %1182 = vst.msk [vmem:[#allocation5] sm:$0xff] %vm1181_vm13, %v1180_v10 }
 0x3be   : > { %v1308_v22 = vpop.permute.xlu2 %1307 }
 0x3c0   : > { %v1272_v13 = vpop.permute.xlu1 %1271 }
 0x3c2   : > { %v1263_v12 = vld [vmem:[#allocation5] sm:$0xff] }
 0x3c3   : > { %v1269_v59 = vmul.f32 %v1267_v11, %v1263_v12 }
 0x3c5   : > { %v1274_v14 = vadd.f32 %v1272_v13, %v1269_v59 }
 0x3c7   : > { %1276 = vst.msk [vmem:[#allocation5] sm:$0xff] %vm1275_vm14, %v1274_v14 }
 0x3ce   : > { %v1296_v15 = vld [vmem:[#allocation5] sm:$0xff] }
 0x3d6   : > { %v1316_v25 = vpop.permute.xlu1 %1315 }
 0x3d7   : > { %v1300_v16 = vpop.permute.xlu0 %1299 }
 0x3d8   : > { %v1302_v17 = vmul.f32 %v1300_v16, %v1296_v15 }
 0x3da   : > { %1304 = vst.msk [vmem:[#allocation5] sm:$0xff] %vm910_vm1, %v1302_v17 }
 0x3e0   : > { %v1324_v29 = vpop.permute.xlu0 %1323 }
 0x3e1   : > { %v1305_v23 = vld [vmem:[#allocation5] sm:$0xff] }
 0x3e2   : > { %v1310_v24 = vmul.f32 %v1308_v22, %v1305_v23 }
 0x3e4   : > { %1312 = vst.msk [vmem:[#allocation5] sm:$0xff] %vm1087_vm12, %v1310_v24 }
 0x3eb   : > { %v1313_v26 = vld [vmem:[#allocation5] sm:$0xff] }
 0x3ec   : > { %v1318_v27 = vmul.f32 %v1316_v25, %v1313_v26 }
 0x3ee   : > { %1320 = vst.msk [vmem:[#allocation5] sm:$0xff] %vm1181_vm13, %v1318_v27 }
 0x3f5   : > { %v1321_v28 = vld [vmem:[#allocation5] sm:$0xff] }
 0x3f6   : > { %v1326_v30 = vmul.f32 %v1324_v29, %v1321_v28 }
 0x3f8   : > { %1328 = vst.msk [vmem:[#allocation5] sm:$0xff] %vm1275_vm14, %v1326_v30 }
 0x3ff   : > { %v1329_v31 = vld [vmem:[#allocation5] sm:$0xff] }
 0x400   : > { %1572 = vmatmul.msk.f32.vlgmr.msra.gmra.mxu2 %vm441_vm0, %v1329_v31 }
 0x483   : > { %v1359_v33 = vpop.f32.mrf.mxu2 }
 0x484   : > { %v1360_v34 = vadd.f32 %v1709_v32, %v1359_v33 }
 0x486   : > { %1362 = vst.msk [vmem:[%s427_s22] sm:$0xff] %vm441_vm0, %v1360_v34 }
 0x487   : > { %1935 = shalt.err (!%p1932_p13)
}
 0x488   : > { %1597 = dma.vmem_to_hbm [thread:$0]  (%p2158_p2), %s1378_s15, 128, %s1380_s3, %s1364_s4  }
 0x489 PF: > { %s1391_s2 = sand.u32 1, %s1986_s24   ;;  %p1620_p0 = pnand %p1532_p6, %p2165_p5 }
 0x48a   : > { %s1392_s21 = scalar_lea.sflag [#allocation8], %s1391_s2 }
 0x48b   : > { %p1621_p4 = pneg %p1620_p0 }
 0x48d   : > { %1981 = dma.done.wait (%p1621_p4), %s1392_s21, 128  }
 0x48e   : > { %1983 = vsyncadd (%p1621_p4), %s1392_s21, 4294967168  ;;  %s28_s29 = sadd.s32 1, %s2006_s29   ;;  %s2378_s18 = sld [smem:[#allocation24_spill]] }
 0x48f   : > { %p25_p7 = scmp.ge.s32.totalorder %s28_s29, 4   ;;  %s2379_s26 = sld [smem:[#allocation27_spill]] }
 0x490   : > { %s2380_s27 = sld [smem:[#allocation25_spill]]  ;;  %s2382_s24 = smov %s1990_s25 }
 0x491   : > { %s2381_s28 = sld [smem:[#allocation26_spill]]  ;;  %27 = sbr.rel (!%p25_p7) target bundleno = 15 (0xf), region = 142 }
 0x494   : > { %s2383_s25 = smov %s2378_s18 }
 0x496   :  { %1398 = vsyncpa [#allocation7], 1 }
 0x497   :  { %1400 = vsyncpa [#allocation7 + $0x1], 1 }
 0x498   :  { %1401 = vsyncpa [#allocation10], 1 }
 0x499   :  { %1403 = vsyncpa [#allocation10 + $0x1], 1 }
 0x49a   :  { %1404 = vsyncpa [#allocation13], 1 }
 0x49b   :  { %1405 = vsyncpa [#allocation16], 1 }
 0x49c   :  { %1406 = vsyncpa [#allocation8], 1 }
 0x49d   :  { %1408 = vsyncpa [#allocation8 + $0x1], 1 }

</bundles_post_ra>
